<compile_context>
chip_gen: v5e
topology: v5e:2x2
jax: 0.10.0
libtpu: 0.0.40
codegen_flags: <defaults>
</compile_context>

<pallas_src>
import functools
import math

import jax
import jax.numpy as jnp
from jax.experimental import pallas as pl
from jax.experimental.pallas import tpu as pltpu


def _block_kernel(x_ref, bias_ref,
                  wqkv_ref, bqkv_ref, wo_ref, bo_ref,
                  g1_ref, be1_ref, w1_ref, b1_ref,
                  w2_ref, b2_ref, g2_ref, be2_ref,
                  o_ref, x_sc,
                  *, heads, c_real, d_real):
    l = pl.program_id(1)
    n_layers = pl.num_programs(1)

    # Load the sequence once per batch element; keep it resident in VMEM
    # scratch across the inner ("arbitrary") layer axis.
    @pl.when(l == 0)
    def _():
        x_sc[...] = x_ref[0]

    x = x_sc[...]                                    # [T, Cp] f32
    T, Cp = x.shape
    Dp = Cp // heads
    inv_c = jnp.float32(1.0 / c_real)
    scale = jnp.float32(1.0 / math.sqrt(d_real))     # real head dim, not padded

    key_bias = bias_ref[0]                           # [1, T] additive 0 / -1e9

    def layer_norm(v, g, b):
        # Padded lanes of v are zero, so sums over the padded lane dim are the
        # real-channel sums; divide by the REAL channel count.  Padded
        # gamma/beta are zero -> padded lanes stay zero after the affine.
        s1 = jnp.sum(v, axis=-1, keepdims=True)
        s2 = jnp.sum(v * v, axis=-1, keepdims=True)
        mu = s1 * inv_c
        var = jnp.maximum(s2 * inv_c - mu * mu, 0.0)   # clamp single-pass form
        return (v - mu) * jax.lax.rsqrt(var + 1e-5) * g + b

    # ---- fused QKV projection (bf16 MXU operands, f32 accumulate) ----------
    qkv = jnp.dot(x.astype(jnp.bfloat16), wqkv_ref[0],
                  preferred_element_type=jnp.float32) + bqkv_ref[0]   # [T, 3Cp]
    # 128-aligned lane slices (Cp is a multiple of 128) -> tile-aligned, cheap.
    q = qkv[:, :Cp] * scale                          # scale q, not [T,T] scores
    k = qkv[:, Cp:2 * Cp]
    v = qkv[:, 2 * Cp:]

    # ---- heads via reshape/transpose (no per-head slice/stack/concat) ------
    qh = jnp.transpose(q.reshape(T, heads, Dp), (1, 0, 2)).astype(jnp.bfloat16)
    kh = jnp.transpose(k.reshape(T, heads, Dp), (1, 0, 2)).astype(jnp.bfloat16)
    vh = jnp.transpose(v.reshape(T, heads, Dp), (1, 0, 2)).astype(jnp.bfloat16)

    # scores[h, i, j] = sum_d q[h, i, d] * k[h, j, d]   (one batched matmul)
    s = jnp.einsum('hid,hjd->hij', qh, kh,
                   preferred_element_type=jnp.float32)          # [H, T, T] f32
    s = s + key_bias                    # implicit broadcast [1,T] -> [H,T,T]
    s = s - jnp.max(s, axis=-1, keepdims=True)
    p = jnp.exp(s)
    p = p * pl.reciprocal(jnp.sum(p, axis=-1, keepdims=True), approx=True)
    ctx = jnp.einsum('hij,hjd->hid', p.astype(jnp.bfloat16), vh,
                     preferred_element_type=jnp.float32)        # [H, T, Dp]

    # Fold the head-concat + output projection into one lane-dense matmul:
    # Wo rows are stored in h-major / d-minor order to match this flatten.
    ctx2 = jnp.transpose(ctx, (1, 0, 2)).reshape(T, Cp)
    attn = jnp.dot(ctx2.astype(jnp.bfloat16), wo_ref[0],
                   preferred_element_type=jnp.float32) + bo_ref[0]

    # ---- AddNorm #1 (post-LN residual) --------------------------------------
    x1 = layer_norm(x + attn, g1_ref[0], be1_ref[0])

    # ---- FeedForward: Linear -> ReLU -> Linear (dropout = 0 at eval) --------
    hid = jnp.maximum(
        jnp.dot(x1.astype(jnp.bfloat16), w1_ref[0],
                preferred_element_type=jnp.float32) + b1_ref[0], 0.0)
    ff = jnp.dot(hid.astype(jnp.bfloat16), w2_ref[0],
                 preferred_element_type=jnp.float32) + b2_ref[0]

    # ---- AddNorm #2 ----------------------------------------------------------
    x_new = layer_norm(x1 + ff, g2_ref[0], be2_ref[0])
    x_sc[...] = x_new

    @pl.when(l == n_layers - 1)
    def _():
        o_ref[0] = x_new


def _run_blocks(x_pad, key_bias, wp, *, heads, c_real, d_real):
    B, T, Cp = x_pad.shape
    L = wp["wqkv"].shape[0]
    kernel = functools.partial(_block_kernel, heads=heads,
                               c_real=c_real, d_real=d_real)

    weight_names = ["wqkv", "bqkv", "wo", "bo", "g1", "be1",
                    "w1", "b1", "w2", "b2", "g2", "be2"]
    weights = [wp[n] for n in weight_names]

    def wspec(arr):
        # One layer slice per grid step along the trailing "arbitrary" axis:
        # weights are streamed (double-buffered) instead of held L-resident.
        n = arr.ndim
        return pl.BlockSpec((1,) + arr.shape[1:],
                            lambda b, l: (l,) + (0,) * (n - 1))

    in_specs = [
        pl.BlockSpec((1, T, Cp), lambda b, l: (b, 0, 0)),   # x (constant over l)
        pl.BlockSpec((1, 1, T), lambda b, l: (b, 0, 0)),    # additive key bias
    ] + [wspec(w) for w in weights]

    return pl.pallas_call(
        kernel,
        out_shape=jax.ShapeDtypeStruct((B, T, Cp), jnp.float32),
        grid=(B, L),
        in_specs=in_specs,
        out_specs=pl.BlockSpec((1, T, Cp), lambda b, l: (b, 0, 0)),
        scratch_shapes=[pltpu.VMEM((T, Cp), jnp.float32)],   # carried activation
        compiler_params=pltpu.CompilerParams(
            dimension_semantics=("parallel", "arbitrary")),
    )(x_pad, key_bias, *weights)


def self_attention_forward(x, packed, mask=None, *, heads):
    """Mirrors SelfAttention.forward: x [B, T, C] f32, mask [B, T] f32."""
    B, T, C = x.shape
    assert C % heads == 0
    Cp = packed["wo"].shape[-1]

    # Tail-pad the activation channel dim to the lane-dense padded width.
    x_pad = jnp.pad(x.astype(jnp.float32), ((0, 0), (0, 0), (0, Cp - C)))

    if mask is not None:
        mask_f = mask.astype(jnp.float32)
    else:
        mask_f = jnp.ones((B, T), jnp.float32)
    # Additive key-mask bias, computed once outside the kernel: [B, 1, T].
    key_bias = jnp.where(mask_f > 0.0, 0.0, -1e9).astype(jnp.float32)[:, None, :]

    out = _run_blocks(x_pad, key_bias, packed,
                      heads=heads, c_real=C, d_real=C // heads)
    out = out[:, :, :C]
    if mask is not None:
        # Original: x * (mask[..., None] * mask[:, None])[..., :1]
        out = out * (mask_f[..., None] * mask_f[:, :1, None])
    return out


def _round_up(v, m):
    return (v + m - 1) // m * m


def init_params(key, channels, ffn, blocks, scale=0.02):
    """Logical (unpadded) per-layer parameters, stacked along the layer axis."""
    C, F, L = channels, ffn, blocks
    ks = jax.random.split(key, 6)

    def dense(k, shape):
        return jax.random.normal(k, shape, jnp.float32) * scale

    return dict(
        wq=dense(ks[0], (L, C, C)), bq=jnp.zeros((L, C), jnp.float32),
        wk=dense(ks[1], (L, C, C)), bk=jnp.zeros((L, C), jnp.float32),
        wv=dense(ks[2], (L, C, C)), bv=jnp.zeros((L, C), jnp.float32),
        wo=dense(ks[3], (L, C, C)), bo=jnp.zeros((L, C), jnp.float32),
        g1=jnp.ones((L, C), jnp.float32), be1=jnp.zeros((L, C), jnp.float32),
        w1=dense(ks[4], (L, C, F)), b1=jnp.zeros((L, F), jnp.float32),
        w2=dense(ks[5], (L, F, C)), b2=jnp.zeros((L, C), jnp.float32),
        g2=jnp.ones((L, C), jnp.float32), be2=jnp.zeros((L, C), jnp.float32),
    )


def pack_params(p, heads):
    """Fuse Wq/Wk/Wv and pad every matmul dim to a multiple of 128 lanes.

    Per-head dims D are padded to Dp so that heads*Dp is a multiple of 128;
    padded rows/cols (and padded gamma/beta) are zero, so together with the
    kernel's real-C LayerNorm divisor the padded lanes stay identically zero
    and the forward pass is bit-for-bit equivalent to the unpadded math.
    """
    L, C, F = p["w1"].shape
    D = C // heads
    Dp = _round_up(D, 128 // math.gcd(heads, 128))
    Cp = heads * Dp                      # multiple of 128, >= C
    Fp = _round_up(F, 128)

    def pad_to(a, axis, size):
        pad = [(0, 0)] * a.ndim
        pad[axis] = (0, size - a.shape[axis])
        return jnp.pad(a, pad)

    def head_cols(w):                    # [L, C, C] -> [L, Cp, Cp]
        w = w.reshape(L, C, heads, D)    # output cols viewed per-head
        w = pad_to(w, 3, Dp)             # pad per-head output dim
        w = pad_to(w, 1, Cp)             # pad input rows (tail)
        return w.reshape(L, Cp, Cp)

    def head_bias(b):                    # [L, C] -> [L, 1, Cp]
        b = b.reshape(L, heads, D)
        b = pad_to(b, 2, Dp)
        return b.reshape(L, 1, Cp)

    wq, wk, wv = head_cols(p["wq"]), head_cols(p["wk"]), head_cols(p["wv"])
    wqkv = jnp.concatenate([wq, wk, wv], axis=2).astype(jnp.bfloat16)
    bqkv = jnp.concatenate(
        [head_bias(p["bq"]), head_bias(p["bk"]), head_bias(p["bv"])], axis=2)

    wo = p["wo"].reshape(L, heads, D, C)  # input rows are head-structured
    wo = pad_to(wo, 2, Dp)
    wo = pad_to(wo, 3, Cp)
    wo = wo.reshape(L, Cp, Cp).astype(jnp.bfloat16)

    def tail(b, size):                   # [L, X] -> [L, 1, size]
        return pad_to(b, 1, size)[:, None, :]

    return dict(
        wqkv=wqkv, bqkv=bqkv,
        wo=wo, bo=tail(p["bo"], Cp),
        g1=tail(p["g1"], Cp), be1=tail(p["be1"], Cp),
        w1=pad_to(pad_to(p["w1"], 1, Cp), 2, Fp).astype(jnp.bfloat16),
        b1=tail(p["b1"], Fp),
        w2=pad_to(pad_to(p["w2"], 1, Fp), 2, Cp).astype(jnp.bfloat16),
        b2=tail(p["b2"], Cp),
        g2=tail(p["g2"], Cp), be2=tail(p["be2"], Cp),
    )


if __name__ == "__main__":
    B, T, CHANNELS, HEADS, FFN, BLOCKS = 2, 8, 32, 4, 64, 2

    key = jax.random.PRNGKey(0)
    kx, kp = jax.random.split(key, 2)
    x = jax.random.normal(kx, (B, T, CHANNELS), jnp.float32)
    lengths = jnp.array([T, T - 3], jnp.int32)
    mask = (jnp.arange(T)[None, :] < lengths[:, None]).astype(jnp.float32)  # [B, T]

    params = init_params(kp, CHANNELS, FFN, BLOCKS)
    packed = pack_params(params, HEADS)

    out = self_attention_forward(x, packed, mask=mask, heads=HEADS)
    out = jax.block_until_ready(out)
    assert out.shape == (B, T, CHANNELS) and out.dtype == jnp.float32
    assert bool(jnp.all(jnp.isfinite(out)))
    # padded positions must be zeroed by the final mask multiply
    assert bool(jnp.all(out[1, T - 3:] == 0.0))
    print("KERNEL_OK")
</pallas_src>

<mosaic_0001>
module attributes {stable_mosaic.version = 11 : i64} {
  func.func @_block_kernel(%arg0: i32, %arg1: i32, %arg2: memref<1x8x128xf32, #tpu.memory_space<vmem>>, %arg3: memref<1x1x8xf32, #tpu.memory_space<vmem>>, %arg4: memref<1x128x384xbf16, #tpu.memory_space<vmem>>, %arg5: memref<1x1x384xf32, #tpu.memory_space<vmem>>, %arg6: memref<1x128x128xbf16, #tpu.memory_space<vmem>>, %arg7: memref<1x1x128xf32, #tpu.memory_space<vmem>>, %arg8: memref<1x1x128xf32, #tpu.memory_space<vmem>>, %arg9: memref<1x1x128xf32, #tpu.memory_space<vmem>>, %arg10: memref<1x128x128xbf16, #tpu.memory_space<vmem>>, %arg11: memref<1x1x128xf32, #tpu.memory_space<vmem>>, %arg12: memref<1x128x128xbf16, #tpu.memory_space<vmem>>, %arg13: memref<1x1x128xf32, #tpu.memory_space<vmem>>, %arg14: memref<1x1x128xf32, #tpu.memory_space<vmem>>, %arg15: memref<1x1x128xf32, #tpu.memory_space<vmem>>, %arg16: memref<1x8x128xf32, #tpu.memory_space<vmem>>, %arg17: memref<8x128xf32, #tpu.memory_space<vmem>>) attributes {dimension_semantics = [#tpu.dimension_semantics<parallel>, #tpu.dimension_semantics<arbitrary>], iteration_bounds = array<i64: 2, 2>, scalar_prefetch = 0 : i64, scratch_operands = 1 : i64, tpu.core_type = #tpu.core_type<tc>, window_params = [{transform_indices = @transform_0, window_bounds = array<i64: 1, 8, 128>}, {transform_indices = @transform_1, window_bounds = array<i64: 1, 1, 8>}, {transform_indices = @transform_2, window_bounds = array<i64: 1, 128, 384>}, {transform_indices = @transform_3, window_bounds = array<i64: 1, 1, 384>}, {transform_indices = @transform_4, window_bounds = array<i64: 1, 128, 128>}, {transform_indices = @transform_5, window_bounds = array<i64: 1, 1, 128>}, {transform_indices = @transform_6, window_bounds = array<i64: 1, 1, 128>}, {transform_indices = @transform_7, window_bounds = array<i64: 1, 1, 128>}, {transform_indices = @transform_8, window_bounds = array<i64: 1, 128, 128>}, {transform_indices = @transform_9, window_bounds = array<i64: 1, 1, 128>}, {transform_indices = @transform_10, window_bounds = array<i64: 1, 128, 128>}, {transform_indices = @transform_11, window_bounds = array<i64: 1, 1, 128>}, {transform_indices = @transform_12, window_bounds = array<i64: 1, 1, 128>}, {transform_indices = @transform_13, window_bounds = array<i64: 1, 1, 128>}, {transform_indices = @transform_14, window_bounds = array<i64: 1, 8, 128>}]} {
    %c0_i32 = arith.constant 0 : i32
    %0 = arith.cmpi eq, %arg1, %c0_i32 : i32
    %1 = arith.extui %0 : i1 to i32
    %c0_i32_0 = arith.constant 0 : i32
    %2 = arith.cmpi ne, %1, %c0_i32_0 : i32
    scf.if %2 {
      %c0_65 = arith.constant 0 : index
      %c0_66 = arith.constant 0 : index
      %c0_67 = arith.constant 0 : index
      %134 = vector.load %arg2[%c0_65, %c0_66, %c0_67] : memref<1x8x128xf32, #tpu.memory_space<vmem>>, vector<1x8x128xf32>
      %135 = vector.shape_cast %134 : vector<1x8x128xf32> to vector<8x128xf32>
      %c0_68 = arith.constant 0 : index
      %c0_69 = arith.constant 0 : index
      %136 = vector.load %arg17[%c0_68, %c0_69] : memref<8x128xf32, #tpu.memory_space<vmem>>, vector<8x128xf32>
      tpu.vector_store %arg17[%c0_68, %c0_69], %135 {strides = array<i32>} : memref<8x128xf32, #tpu.memory_space<vmem>>, vector<8x128xf32>,
    } else {
    }
    %c0 = arith.constant 0 : index
    %c0_1 = arith.constant 0 : index
    %3 = vector.load %arg17[%c0, %c0_1] : memref<8x128xf32, #tpu.memory_space<vmem>>, vector<8x128xf32>
    %c0_2 = arith.constant 0 : index
    %c0_3 = arith.constant 0 : index
    %c0_4 = arith.constant 0 : index
    %4 = vector.load %arg3[%c0_2, %c0_3, %c0_4] : memref<1x1x8xf32, #tpu.memory_space<vmem>>, vector<1x1x8xf32>
    %5 = vector.shape_cast %4 : vector<1x1x8xf32> to vector<1x8xf32>
    %6 = arith.truncf %3 : vector<8x128xf32> to vector<8x128xbf16>
    %c0_5 = arith.constant 0 : index
    %c0_6 = arith.constant 0 : index
    %c0_7 = arith.constant 0 : index
    %7 = vector.load %arg4[%c0_5, %c0_6, %c0_7] : memref<1x128x384xbf16, #tpu.memory_space<vmem>>, vector<1x128x384xbf16>
    %8 = vector.shape_cast %7 : vector<1x128x384xbf16> to vector<128x384xbf16>
    %cst = arith.constant dense<0.000000e+00> : vector<8x384xf32>
    %9 = tpu.matmul %6, %8, %cst {dimension_numbers = #tpu.dot_dimension_numbers<[1], [0], [0], [1], [0, 0, 1, 1], [], []>} : vector<8x128xbf16>, vector<128x384xbf16>, vector<8x384xf32> -> vector<8x384xf32>
    %c0_8 = arith.constant 0 : index
    %c0_9 = arith.constant 0 : index
    %c0_10 = arith.constant 0 : index
    %10 = vector.load %arg5[%c0_8, %c0_9, %c0_10] : memref<1x1x384xf32, #tpu.memory_space<vmem>>, vector<1x1x384xf32>
    %11 = vector.shape_cast %10 : vector<1x1x384xf32> to vector<1x384xf32>
    %12 = vector.broadcast %11 : vector<1x384xf32> to vector<8x384xf32>
    %13 = arith.addf %9, %12 : vector<8x384xf32>
    %14 = vector.extract_strided_slice %13 {offsets = [0, 0], sizes = [8, 128], strides = [1, 1]} : vector<8x384xf32> to vector<8x128xf32>
    %cst_11 = arith.constant 0.353553385 : f32
    %15 = vector.broadcast %cst_11 : f32 to vector<8x128xf32>
    %16 = arith.mulf %14, %15 : vector<8x128xf32>
    %17 = vector.extract_strided_slice %13 {offsets = [0, 128], sizes = [8, 128], strides = [1, 1]} : vector<8x384xf32> to vector<8x128xf32>
    %18 = vector.extract_strided_slice %13 {offsets = [0, 256], sizes = [8, 128], strides = [1, 1]} : vector<8x384xf32> to vector<8x128xf32>
    %19 = vector.shape_cast %16 : vector<8x128xf32> to vector<8x4x32xf32>
    %20 = tpu.transpose %19, [1, 0, 2] : vector<8x4x32xf32> -> vector<4x8x32xf32>
    %21 = arith.truncf %20 : vector<4x8x32xf32> to vector<4x8x32xbf16>
    %22 = vector.shape_cast %17 : vector<8x128xf32> to vector<8x4x32xf32>
    %23 = tpu.transpose %22, [1, 0, 2] : vector<8x4x32xf32> -> vector<4x8x32xf32>
    %24 = arith.truncf %23 : vector<4x8x32xf32> to vector<4x8x32xbf16>
    %25 = vector.shape_cast %18 : vector<8x128xf32> to vector<8x4x32xf32>
    %26 = tpu.transpose %25, [1, 0, 2] : vector<8x4x32xf32> -> vector<4x8x32xf32>
    %27 = arith.truncf %26 : vector<4x8x32xf32> to vector<4x8x32xbf16>
    "tpu.trace_start"() <{level = 10 : i32, message = "hid,hjd->hij"}> : () -> ()
    %cst_12 = arith.constant dense<0.000000e+00> : vector<4x8x8xf32>
    %28 = tpu.matmul %21, %24, %cst_12 {dimension_numbers = #tpu.dot_dimension_numbers<[2], [2], [1], [1], [0, 0, 0, 1, 1, 1], [0], [0]>} : vector<4x8x32xbf16>, vector<4x8x32xbf16>, vector<4x8x8xf32> -> vector<4x8x8xf32>
    "tpu.trace_stop"() : () -> ()
    %29 = vector.shape_cast %5 : vector<1x8xf32> to vector<1x1x8xf32>
    %30 = vector.broadcast %29 : vector<1x1x8xf32> to vector<4x8x8xf32>
    %31 = arith.addf %28, %30 : vector<4x8x8xf32>
    %cst_13 = arith.constant dense<0xFF800000> : vector<4x8xf32>
    %32 = vector.multi_reduction <maximumf>, %31, %cst_13 [2] : vector<4x8x8xf32> to vector<4x8xf32>
    %33 = vector.shape_cast %32 : vector<4x8xf32> to vector<4x8x1xf32>
    %34 = vector.broadcast %33 : vector<4x8x1xf32> to vector<4x8x8xf32>
    %35 = arith.subf %31, %34 : vector<4x8x8xf32>
    %36 = math.exp %35 : vector<4x8x8xf32>
    %cst_14 = arith.constant dense<0.000000e+00> : vector<4x8xf32>
    %37 = vector.multi_reduction <add>, %36, %cst_14 [2] : vector<4x8x8xf32> to vector<4x8xf32>
    %38 = vector.shape_cast %37 : vector<4x8xf32> to vector<4x8x1xf32>
    %39 = tpu.reciprocal %38 {approx = true} : vector<4x8x1xf32> -> vector<4x8x1xf32>
    %40 = vector.broadcast %39 : vector<4x8x1xf32> to vector<4x8x8xf32>
    %41 = arith.mulf %36, %40 : vector<4x8x8xf32>
    %42 = arith.truncf %41 : vector<4x8x8xf32> to vector<4x8x8xbf16>
    "tpu.trace_start"() <{level = 10 : i32, message = "hij,hjd->hid"}> : () -> ()
    %cst_15 = arith.constant dense<0.000000e+00> : vector<4x8x32xf32>
    %43 = tpu.matmul %42, %27, %cst_15 {dimension_numbers = #tpu.dot_dimension_numbers<[2], [1], [1], [2], [0, 0, 0, 1, 1, 2], [0], [0]>} : vector<4x8x8xbf16>, vector<4x8x32xbf16>, vector<4x8x32xf32> -> vector<4x8x32xf32>
    "tpu.trace_stop"() : () -> ()
    %44 = tpu.transpose %43, [1, 0, 2] : vector<4x8x32xf32> -> vector<8x4x32xf32>
    %45 = vector.shape_cast %44 : vector<8x4x32xf32> to vector<8x128xf32>
    %46 = arith.truncf %45 : vector<8x128xf32> to vector<8x128xbf16>
    %c0_16 = arith.constant 0 : index
    %c0_17 = arith.constant 0 : index
    %c0_18 = arith.constant 0 : index
    %47 = vector.load %arg6[%c0_16, %c0_17, %c0_18] : memref<1x128x128xbf16, #tpu.memory_space<vmem>>, vector<1x128x128xbf16>
    %48 = vector.shape_cast %47 : vector<1x128x128xbf16> to vector<128x128xbf16>
    %cst_19 = arith.constant dense<0.000000e+00> : vector<8x128xf32>
    %49 = tpu.matmul %46, %48, %cst_19 {dimension_numbers = #tpu.dot_dimension_numbers<[1], [0], [0], [1], [0, 0, 1, 1], [], []>} : vector<8x128xbf16>, vector<128x128xbf16>, vector<8x128xf32> -> vector<8x128xf32>
    %c0_20 = arith.constant 0 : index
    %c0_21 = arith.constant 0 : index
    %c0_22 = arith.constant 0 : index
    %50 = vector.load %arg7[%c0_20, %c0_21, %c0_22] : memref<1x1x128xf32, #tpu.memory_space<vmem>>, vector<1x1x128xf32>
    %51 = vector.shape_cast %50 : vector<1x1x128xf32> to vector<1x128xf32>
    %52 = vector.broadcast %51 : vector<1x128xf32> to vector<8x128xf32>
    %53 = arith.addf %49, %52 : vector<8x128xf32>
    %54 = arith.addf %3, %53 : vector<8x128xf32>
    %c0_23 = arith.constant 0 : index
    %c0_24 = arith.constant 0 : index
    %c0_25 = arith.constant 0 : index
    %55 = vector.load %arg8[%c0_23, %c0_24, %c0_25] : memref<1x1x128xf32, #tpu.memory_space<vmem>>, vector<1x1x128xf32>
    %56 = vector.shape_cast %55 : vector<1x1x128xf32> to vector<1x128xf32>
    %c0_26 = arith.constant 0 : index
    %c0_27 = arith.constant 0 : index
    %c0_28 = arith.constant 0 : index
    %57 = vector.load %arg9[%c0_26, %c0_27, %c0_28] : memref<1x1x128xf32, #tpu.memory_space<vmem>>, vector<1x1x128xf32>
    %58 = vector.shape_cast %57 : vector<1x1x128xf32> to vector<1x128xf32>
    %cst_29 = arith.constant dense<0.000000e+00> : vector<8xf32>
    %59 = vector.multi_reduction <add>, %54, %cst_29 [1] : vector<8x128xf32> to vector<8xf32>
    %60 = vector.shape_cast %59 : vector<8xf32> to vector<8x1xf32>
    %61 = arith.mulf %54, %54 : vector<8x128xf32>
    %cst_30 = arith.constant dense<0.000000e+00> : vector<8xf32>
    %62 = vector.multi_reduction <add>, %61, %cst_30 [1] : vector<8x128xf32> to vector<8xf32>
    %63 = vector.shape_cast %62 : vector<8xf32> to vector<8x1xf32>
    %cst_31 = arith.constant 3.125000e-02 : f32
    %64 = vector.broadcast %cst_31 : f32 to vector<8x1xf32>
    %65 = arith.mulf %60, %64 : vector<8x1xf32>
    %cst_32 = arith.constant 3.125000e-02 : f32
    %66 = vector.broadcast %cst_32 : f32 to vector<8x1xf32>
    %67 = arith.mulf %63, %66 : vector<8x1xf32>
    %68 = arith.mulf %65, %65 : vector<8x1xf32>
    %69 = arith.subf %67, %68 : vector<8x1xf32>
    %cst_33 = arith.constant 0.000000e+00 : f32
    %70 = vector.broadcast %cst_33 : f32 to vector<8x1xf32>
    %71 = arith.maximumf %69, %70 : vector<8x1xf32>
    %72 = vector.broadcast %65 : vector<8x1xf32> to vector<8x128xf32>
    %73 = arith.subf %54, %72 : vector<8x128xf32>
    %cst_34 = arith.constant 9.99999974E-6 : f32
    %74 = vector.broadcast %cst_34 : f32 to vector<8x1xf32>
    %75 = arith.addf %71, %74 : vector<8x1xf32>
    %76 = math.rsqrt %75 : vector<8x1xf32>
    %77 = vector.broadcast %76 : vector<8x1xf32> to vector<8x128xf32>
    %78 = arith.mulf %73, %77 : vector<8x128xf32>
    %79 = vector.broadcast %56 : vector<1x128xf32> to vector<8x128xf32>
    %80 = arith.mulf %78, %79 : vector<8x128xf32>
    %81 = vector.broadcast %58 : vector<1x128xf32> to vector<8x128xf32>
    %82 = arith.addf %80, %81 : vector<8x128xf32>
    %83 = arith.truncf %82 : vector<8x128xf32> to vector<8x128xbf16>
    %c0_35 = arith.constant 0 : index
    %c0_36 = arith.constant 0 : index
    %c0_37 = arith.constant 0 : index
    %84 = vector.load %arg10[%c0_35, %c0_36, %c0_37] : memref<1x128x128xbf16, #tpu.memory_space<vmem>>, vector<1x128x128xbf16>
    %85 = vector.shape_cast %84 : vector<1x128x128xbf16> to vector<128x128xbf16>
    %cst_38 = arith.constant dense<0.000000e+00> : vector<8x128xf32>
    %86 = tpu.matmul %83, %85, %cst_38 {dimension_numbers = #tpu.dot_dimension_numbers<[1], [0], [0], [1], [0, 0, 1, 1], [], []>} : vector<8x128xbf16>, vector<128x128xbf16>, vector<8x128xf32> -> vector<8x128xf32>
    %c0_39 = arith.constant 0 : index
    %c0_40 = arith.constant 0 : index
    %c0_41 = arith.constant 0 : index
    %87 = vector.load %arg11[%c0_39, %c0_40, %c0_41] : memref<1x1x128xf32, #tpu.memory_space<vmem>>, vector<1x1x128xf32>
    %88 = vector.shape_cast %87 : vector<1x1x128xf32> to vector<1x128xf32>
    %89 = vector.broadcast %88 : vector<1x128xf32> to vector<8x128xf32>
    %90 = arith.addf %86, %89 : vector<8x128xf32>
    %cst_42 = arith.constant 0.000000e+00 : f32
    %91 = vector.broadcast %cst_42 : f32 to vector<8x128xf32>
    %92 = arith.maximumf %90, %91 : vector<8x128xf32>
    %93 = arith.truncf %92 : vector<8x128xf32> to vector<8x128xbf16>
    %c0_43 = arith.constant 0 : index
    %c0_44 = arith.constant 0 : index
    %c0_45 = arith.constant 0 : index
    %94 = vector.load %arg12[%c0_43, %c0_44, %c0_45] : memref<1x128x128xbf16, #tpu.memory_space<vmem>>, vector<1x128x128xbf16>
    %95 = vector.shape_cast %94 : vector<1x128x128xbf16> to vector<128x128xbf16>
    %cst_46 = arith.constant dense<0.000000e+00> : vector<8x128xf32>
    %96 = tpu.matmul %93, %95, %cst_46 {dimension_numbers = #tpu.dot_dimension_numbers<[1], [0], [0], [1], [0, 0, 1, 1], [], []>} : vector<8x128xbf16>, vector<128x128xbf16>, vector<8x128xf32> -> vector<8x128xf32>
    %c0_47 = arith.constant 0 : index
    %c0_48 = arith.constant 0 : index
    %c0_49 = arith.constant 0 : index
    %97 = vector.load %arg13[%c0_47, %c0_48, %c0_49] : memref<1x1x128xf32, #tpu.memory_space<vmem>>, vector<1x1x128xf32>
    %98 = vector.shape_cast %97 : vector<1x1x128xf32> to vector<1x128xf32>
    %99 = vector.broadcast %98 : vector<1x128xf32> to vector<8x128xf32>
    %100 = arith.addf %96, %99 : vector<8x128xf32>
    %101 = arith.addf %82, %100 : vector<8x128xf32>
    %c0_50 = arith.constant 0 : index
    %c0_51 = arith.constant 0 : index
    %c0_52 = arith.constant 0 : index
    %102 = vector.load %arg14[%c0_50, %c0_51, %c0_52] : memref<1x1x128xf32, #tpu.memory_space<vmem>>, vector<1x1x128xf32>
    %103 = vector.shape_cast %102 : vector<1x1x128xf32> to vector<1x128xf32>
    %c0_53 = arith.constant 0 : index
    %c0_54 = arith.constant 0 : index
    %c0_55 = arith.constant 0 : index
    %104 = vector.load %arg15[%c0_53, %c0_54, %c0_55] : memref<1x1x128xf32, #tpu.memory_space<vmem>>, vector<1x1x128xf32>
    %105 = vector.shape_cast %104 : vector<1x1x128xf32> to vector<1x128xf32>
    %cst_56 = arith.constant dense<0.000000e+00> : vector<8xf32>
    %106 = vector.multi_reduction <add>, %101, %cst_56 [1] : vector<8x128xf32> to vector<8xf32>
    %107 = vector.shape_cast %106 : vector<8xf32> to vector<8x1xf32>
    %108 = arith.mulf %101, %101 : vector<8x128xf32>
    %cst_57 = arith.constant dense<0.000000e+00> : vector<8xf32>
    %109 = vector.multi_reduction <add>, %108, %cst_57 [1] : vector<8x128xf32> to vector<8xf32>
    %110 = vector.shape_cast %109 : vector<8xf32> to vector<8x1xf32>
    %cst_58 = arith.constant 3.125000e-02 : f32
    %111 = vector.broadcast %cst_58 : f32 to vector<8x1xf32>
    %112 = arith.mulf %107, %111 : vector<8x1xf32>
    %cst_59 = arith.constant 3.125000e-02 : f32
    %113 = vector.broadcast %cst_59 : f32 to vector<8x1xf32>
    %114 = arith.mulf %110, %113 : vector<8x1xf32>
    %115 = arith.mulf %112, %112 : vector<8x1xf32>
    %116 = arith.subf %114, %115 : vector<8x1xf32>
    %cst_60 = arith.constant 0.000000e+00 : f32
    %117 = vector.broadcast %cst_60 : f32 to vector<8x1xf32>
    %118 = arith.maximumf %116, %117 : vector<8x1xf32>
    %119 = vector.broadcast %112 : vector<8x1xf32> to vector<8x128xf32>
    %120 = arith.subf %101, %119 : vector<8x128xf32>
    %cst_61 = arith.constant 9.99999974E-6 : f32
    %121 = vector.broadcast %cst_61 : f32 to vector<8x1xf32>
    %122 = arith.addf %118, %121 : vector<8x1xf32>
    %123 = math.rsqrt %122 : vector<8x1xf32>
    %124 = vector.broadcast %123 : vector<8x1xf32> to vector<8x128xf32>
    %125 = arith.mulf %120, %124 : vector<8x128xf32>
    %126 = vector.broadcast %103 : vector<1x128xf32> to vector<8x128xf32>
    %127 = arith.mulf %125, %126 : vector<8x128xf32>
    %128 = vector.broadcast %105 : vector<1x128xf32> to vector<8x128xf32>
    %129 = arith.addf %127, %128 : vector<8x128xf32>
    %c0_62 = arith.constant 0 : index
    %c0_63 = arith.constant 0 : index
    %130 = vector.load %arg17[%c0_62, %c0_63] : memref<8x128xf32, #tpu.memory_space<vmem>>, vector<8x128xf32>
    tpu.vector_store %arg17[%c0_62, %c0_63], %129 {strides = array<i32>} : memref<8x128xf32, #tpu.memory_space<vmem>>, vector<8x128xf32>,
    %c1_i32 = arith.constant 1 : i32
    %131 = arith.cmpi eq, %arg1, %c1_i32 : i32
    %132 = arith.extui %131 : i1 to i32
    %c0_i32_64 = arith.constant 0 : i32
    %133 = arith.cmpi ne, %132, %c0_i32_64 : i32
    scf.if %133 {
      %c0_65 = arith.constant 0 : index
      %c0_66 = arith.constant 0 : index
      %c0_67 = arith.constant 0 : index
      %134 = vector.load %arg16[%c0_65, %c0_66, %c0_67] : memref<1x8x128xf32, #tpu.memory_space<vmem>>, vector<1x8x128xf32>
      %135 = vector.shape_cast %134 : vector<1x8x128xf32> to vector<8x128xf32>
      %136 = vector.shape_cast %129 : vector<8x128xf32> to vector<1x8x128xf32>
      tpu.vector_store %arg16[%c0_65, %c0_66, %c0_67], %136 {strides = array<i32>} : memref<1x8x128xf32, #tpu.memory_space<vmem>>, vector<1x8x128xf32>,
    } else {
    }
    return
  }
  func.func @transform_0(%arg0: i32, %arg1: i32) -> (i32, i32, i32) {
    %c0_i32 = arith.constant 0 : i32
    %c0_i32_0 = arith.constant 0 : i32
    %c0_i32_1 = arith.constant 0 : i32
    return %arg0, %c0_i32, %c0_i32_0 : i32, i32, i32
  }
  func.func @transform_1(%arg0: i32, %arg1: i32) -> (i32, i32, i32) {
    %c0_i32 = arith.constant 0 : i32
    %c0_i32_0 = arith.constant 0 : i32
    %c0_i32_1 = arith.constant 0 : i32
    return %arg0, %c0_i32, %c0_i32_0 : i32, i32, i32
  }
  func.func @transform_2(%arg0: i32, %arg1: i32) -> (i32, i32, i32) {
    %c0_i32 = arith.constant 0 : i32
    %c0_i32_0 = arith.constant 0 : i32
    %c0_i32_1 = arith.constant 0 : i32
    return %arg1, %c0_i32, %c0_i32_0 : i32, i32, i32
  }
  func.func @transform_3(%arg0: i32, %arg1: i32) -> (i32, i32, i32) {
    %c0_i32 = arith.constant 0 : i32
    %c0_i32_0 = arith.constant 0 : i32
    %c0_i32_1 = arith.constant 0 : i32
    return %arg1, %c0_i32, %c0_i32_0 : i32, i32, i32
  }
  func.func @transform_4(%arg0: i32, %arg1: i32) -> (i32, i32, i32) {
    %c0_i32 = arith.constant 0 : i32
    %c0_i32_0 = arith.constant 0 : i32
    %c0_i32_1 = arith.constant 0 : i32
    return %arg1, %c0_i32, %c0_i32_0 : i32, i32, i32
  }
  func.func @transform_5(%arg0: i32, %arg1: i32) -> (i32, i32, i32) {
    %c0_i32 = arith.constant 0 : i32
    %c0_i32_0 = arith.constant 0 : i32
    %c0_i32_1 = arith.constant 0 : i32
    return %arg1, %c0_i32, %c0_i32_0 : i32, i32, i32
  }
  func.func @transform_6(%arg0: i32, %arg1: i32) -> (i32, i32, i32) {
    %c0_i32 = arith.constant 0 : i32
    %c0_i32_0 = arith.constant 0 : i32
    %c0_i32_1 = arith.constant 0 : i32
    return %arg1, %c0_i32, %c0_i32_0 : i32, i32, i32
  }
  func.func @transform_7(%arg0: i32, %arg1: i32) -> (i32, i32, i32) {
    %c0_i32 = arith.constant 0 : i32
    %c0_i32_0 = arith.constant 0 : i32
    %c0_i32_1 = arith.constant 0 : i32
    return %arg1, %c0_i32, %c0_i32_0 : i32, i32, i32
  }
  func.func @transform_8(%arg0: i32, %arg1: i32) -> (i32, i32, i32) {
    %c0_i32 = arith.constant 0 : i32
    %c0_i32_0 = arith.constant 0 : i32
    %c0_i32_1 = arith.constant 0 : i32
    return %arg1, %c0_i32, %c0_i32_0 : i32, i32, i32
  }
  func.func @transform_9(%arg0: i32, %arg1: i32) -> (i32, i32, i32) {
    %c0_i32 = arith.constant 0 : i32
    %c0_i32_0 = arith.constant 0 : i32
    %c0_i32_1 = arith.constant 0 : i32
    return %arg1, %c0_i32, %c0_i32_0 : i32, i32, i32
  }
  func.func @transform_10(%arg0: i32, %arg1: i32) -> (i32, i32, i32) {
    %c0_i32 = arith.constant 0 : i32
    %c0_i32_0 = arith.constant 0 : i32
    %c0_i32_1 = arith.constant 0 : i32
    return %arg1, %c0_i32, %c0_i32_0 : i32, i32, i32
  }
  func.func @transform_11(%arg0: i32, %arg1: i32) -> (i32, i32, i32) {
    %c0_i32 = arith.constant 0 : i32
    %c0_i32_0 = arith.constant 0 : i32
    %c0_i32_1 = arith.constant 0 : i32
    return %arg1, %c0_i32, %c0_i32_0 : i32, i32, i32
  }
  func.func @transform_12(%arg0: i32, %arg1: i32) -> (i32, i32, i32) {
    %c0_i32 = arith.constant 0 : i32
    %c0_i32_0 = arith.constant 0 : i32
    %c0_i32_1 = arith.constant 0 : i32
    return %arg1, %c0_i32, %c0_i32_0 : i32, i32, i32
  }
  func.func @transform_13(%arg0: i32, %arg1: i32) -> (i32, i32, i32) {
    %c0_i32 = arith.constant 0 : i32
    %c0_i32_0 = arith.constant 0 : i32
    %c0_i32_1 = arith.constant 0 : i32
    return %arg1, %c0_i32, %c0_i32_0 : i32, i32, i32
  }
  func.func @transform_14(%arg0: i32, %arg1: i32) -> (i32, i32, i32) {
    %c0_i32 = arith.constant 0 : i32
    %c0_i32_0 = arith.constant 0 : i32
    %c0_i32_1 = arith.constant 0 : i32
    return %arg0, %c0_i32, %c0_i32_0 : i32, i32, i32
  }
}

</mosaic_0001>

<bundles_post_ra>
// kernel: tpu_custom_call.1
= control target key start
LH: loop header
LB: loop body
LE: loop exit
PB: predicated region body
PF: predicated region fallthrough
CT: control target
= control target key end

     0   :  { %s4045_s0 = inlined_call_operand.hbm [shape: f32[2,8,128], index: 0, kind: input, shape index: {}]   ;;  %s4046_s1 = inlined_call_operand.hbm [shape: f32[2,1,8], index: 1, kind: input, shape index: {}]   ;;  %s4047_s2 = inlined_call_operand.hbm [shape: bf16[2,128,384], index: 2, kind: input, shape index: {}]   ;;  %s4048_s3 = inlined_call_operand.hbm [shape: f32[2,1,384], index: 3, kind: input, shape index: {}]   ;;  %s4049_s4 = inlined_call_operand.hbm [shape: bf16[2,128,128], index: 4, kind: input, shape index: {}]   ;;  %s4050_s5 = inlined_call_operand.vmem [shape: f32[2,1,128], index: 5, kind: input, shape index: {}]   ;;  %s4051_s6 = inlined_call_operand.vmem [shape: f32[2,1,128], index: 6, kind: input, shape index: {}]   ;;  %s4052_s7 = inlined_call_operand.vmem [shape: f32[2,1,128], index: 7, kind: input, shape index: {}]   ;;  %s4053_s8 = inlined_call_operand.hbm [shape: bf16[2,128,128], index: 8, kind: input, shape index: {}]   ;;  %s4054_s9 = inlined_call_operand.vmem [shape: f32[2,1,128], index: 9, kind: input, shape index: {}]   ;;  %s4055_s10 = inlined_call_operand.hbm [shape: bf16[2,128,128], index: 10, kind: input, shape index: {}]   ;;  %s4056_s11 = inlined_call_operand.vmem [shape: f32[2,1,128], index: 11, kind: input, shape index: {}]   ;;  %s4057_s12 = inlined_call_operand.hbm [shape: f32[2,1,128], index: 12, kind: input, shape index: {}]   ;;  %s4058_s13 = inlined_call_operand.vmem [shape: f32[2,1,128], index: 13, kind: input, shape index: {}]   ;;  %s4059_s14 = inlined_call_operand.hbm [shape: f32[2,8,128], index: 14, kind: output, shape index: {}]  }
   0x1   :  { %4086 = sst [smem:[#allocation45_spill]] %s4045_s0 }
   0x2   :  { %4087 = sst [smem:[#allocation46_spill]] %s4046_s1 }
   0x3   :  { %4088 = sst [smem:[#allocation47_spill]] %s4047_s2 }
   0x4   :  { %4089 = sst [smem:[#allocation48_spill]] %s4048_s3 }
   0x5   :  { %4090 = sst [smem:[#allocation49_spill]] %s4049_s4 }
   0x6   :  { %4091 = sst [smem:[#allocation50_spill]] %s4050_s5 }
   0x7   :  { %4092 = sst [smem:[#allocation51_spill]] %s4051_s6 }
   0x8   :  { %4093 = sst [smem:[#allocation52_spill]] %s4052_s7 }
   0x9   :  { %4094 = sst [smem:[#allocation53_spill]] %s4053_s8 }
   0xa   :  { %4095 = sst [smem:[#allocation54_spill]] %s4054_s9 }
   0xb   :  { %4096 = sst [smem:[#allocation55_spill]] %s4055_s10 }
   0xc   :  { %4097 = sst [smem:[#allocation56_spill]] %s4056_s11 }
   0xd   :  { %4098 = sst [smem:[#allocation57_spill]] %s4057_s12 }
   0xe   :  { %4099 = sst [smem:[#allocation58_spill]] %s4058_s13 }
   0xf   :  { %4100 = sst [smem:[#allocation59_spill]] %s4059_s14 }
  0x10   :  { %19 = vsyncpa [#allocation4], 0 }
  0x11   :  { %21 = vsyncpa [#allocation4 + $0x1], 0 }
  0x12   :  { %22 = vsyncpa [#allocation7], 0 }
  0x13   :  { %24 = vsyncpa [#allocation7 + $0x1], 0 }
  0x14   :  { %25 = vsyncpa [#allocation10], 0 }
  0x15   :  { %27 = vsyncpa [#allocation10 + $0x1], 0 }
  0x16   :  { %28 = vsyncpa [#allocation13], 0 }
  0x17   :  { %30 = vsyncpa [#allocation13 + $0x1], 0 }
  0x18   :  { %31 = vsyncpa [#allocation16], 0 }
  0x19   :  { %33 = vsyncpa [#allocation16 + $0x1], 0 }
  0x1a   :  { %34 = vsyncpa [#allocation5], 0 }
  0x1b   :  { %36 = vsyncpa [#allocation5 + $0x1], 0  ;;  %s3316_s29 = smov 0   ;;  %s3318_s30 = smov 0  }
  0x1c   :  { %s3320_s15 = smov 0   ;;  %s3322_s16 = smov 0  }
  0x1d   :  { %s3324_s17 = smov 0   ;;  %s3326_s18 = smov 0  }
  0x1e   :  { %s3328_s19 = smov 0   ;;  %s3330_s20 = smov 0  }
  0x1f   :  { %s3332_s21 = smov 0   ;;  %s3334_s22 = smov 0  }
  0x20   :  { %s3336_s23 = smov 0  }
  0x21 LB: > { %4101 = sst [smem:[#allocation25_spill]] %s3194_s30  ;;  %s3370_s24 = sadd.s32 4294967295, %s3230_s23   ;;  %s3230_s23 = sphi %s3336_s23, %s42_s23   ;;  %s3226_s22 = sphi %s3334_s22, %s4184_s22   ;;  %s3222_s21 = sphi %s3332_s21, %s4183_s21   ;;  %s3218_s20 = sphi %s3330_s20, %s4182_s20   ;;  %s3214_s19 = sphi %s3328_s19, %s4181_s19   ;;  %s3210_s18 = sphi %s3326_s18, %s4180_s18   ;;  %s3206_s17 = sphi %s3324_s17, %s4179_s17   ;;  %s3202_s16 = sphi %s3322_s16, %s4178_s16   ;;  %s3198_s15 = sphi %s3320_s15, %s4177_s15   ;;  %s3194_s30 = sphi %s3318_s30, %s4176_s30   ;;  %s3190_s29 = sphi %s3316_s29, %s4175_s29  }
  0x22   : > { %4102 = sst [smem:[#allocation26_spill]] %s3198_s15  ;;  %s2390_s25 = sadd.s32 4294967294, %s3230_s23  }
  0x23   : > { %4103 = sst [smem:[#allocation27_spill]] %s3202_s16  ;;  %p68_p0 = scmp.ne.s32.totalorder %s3210_s18, %s3206_s17 }
  0x24   : > { %4104 = sst [smem:[#allocation28_spill]] %s3206_s17  ;;  %p69_p1 = scmp.eq.s32.totalorder %s3230_s23, 0 }
  0x25   : > { %4105 = sst [smem:[#allocation29_spill]] %s3210_s18  ;;  %p74_p2 = scmp.ne.s32.totalorder %s3206_s17, %s3202_s16 }
  0x26   : > { %4106 = sst [smem:[#allocation30_spill]] %s3214_s19  ;;  %p75_p3 = scmp.eq.s32.totalorder %s3370_s24, 0 }
  0x27   : > { %4107 = sst [smem:[#allocation31_spill]] %s3218_s20  ;;  %p3384_p4 = por %p69_p1, %p68_p0 }
  0x28   : > { %4108 = sst [smem:[#allocation32_spill]] %s3222_s21  ;;  %p3389_p5 = por %p75_p3, %p74_p2 }
  0x29   : > { %4109 = sst [smem:[#allocation33_spill]] %s3226_s22  ;;  %p120_p6 = scmp.ne.s32.totalorder %s3198_s15, %s3194_s30 }
  0x2a   : > { %4110 = sst [smem:[#allocation34_spill]] %s3230_s23  ;;  %p126_p7 = scmp.ne.s32.totalorder %s3194_s30, %s3190_s29 }
  0x2b   : > { %4111 = sst [smem:[#allocation35_spill]] %s3370_s24  ;;  %p436_p8 = scmp.eq.s32.totalorder %s3370_s24, 3 }
  0x2c   : > { %s4113_s20 = scalar_select %p3389_p5, 1, 0 }
  0x2d   : > { %p3397_p9 = por %p120_p6, %p69_p1  ;;  %p442_p10 = scmp.eq.s32.totalorder %s2390_s25, 3 }
  0x2e   : > { %4114 = sst [smem:[#allocation36_spill]] %s4113_s20  ;;  %p3401_p11 = por %p126_p7, %p75_p3 }
  0x2f   : > { %p3408_p12 = por %p436_p8, %p68_p0  ;;  %p3412_p13 = por %p442_p10, %p74_p2 }
  0x30   : > { %s4116_s26 = scalar_select %p3401_p11, 1, 0 }
  0x31   : > { %s4118_s14 = scalar_select %p3408_p12, 1, 0 }
  0x32   : > { %4117 = sst [smem:[#allocation37_spill]] %s4116_s26  ;;  %p2721_p1 = scmp.lt.s32.totalorder %s3230_s23, 4 }
  0x33   : > { %4119 = sst [smem:[#allocation38_spill]] %s4118_s14  ;;  %s3418_s16 = sand.u32 1, %s3210_s18  }
  0x34   : > { %s4120_s29 = scalar_select %p3412_p13, 1, 0 }
  0x35   : > { %s3421_s25 = sand.u32 1, %s3230_s23   ;;  %p3425_p0 = pnand %p2721_p1, %p3384_p4 }
  0x36   : > { %4121 = sst [smem:[#allocation39_spill]] %s4120_s29  ;;  %s484_s9 = scalar_lea.vmem [#allocation6], %s3418_s16 }
  0x37   : > { %s4123_s1 = sld [smem:[#allocation46_spill]]  ;;  %s491_s7 = sshll.u32 %s484_s9, 4  ;;  %s492_s7 = int_to_ptr.vmem [resolvable:$true] %s491_s7 }
  0x38   : > { %s4065_s28 = scalar_lea.sflag [#allocation7], %s3421_s25  ;;  %p3441_p2 = pnand %p2721_p1, %p3397_p9 }
  0x39   : > { %p2405_p3 = scmp.ge.s32.totalorder %s3230_s23, 1  ;;  %p656_p4 = scmp.lt.s32.totalorder %s3230_s23, 5 }
  0x3a   : > { %s51_s11 = sadd.s32 1, %s3222_s21  ;;  %s3453_s14 = sand.u32 1, %s3198_s15  }
  0x3b   : > { %p3447_p6 = pnand %p2405_p3, %p656_p4  ;;  %p52_p7 = scmp.ge.s32.totalorder %s51_s11, 2 }
  0x3c   : > { %s4127_s27 = sadd.s32 1, %s3226_s22  ;;  %s4129_s19 = sadd.s32 1, %s3198_s15 }
  0x3d   : > { %s487_s29 = scalar_lea.hbm %s4123_s1, %s3226_s22  ;;  %s4186_s11 = smov (%p52_p7, %s51_s11), 0 }
  0x3e   : > { %s489_s6 = sshll.u32 %s487_s29, 4  ;;  %4126 = sst [smem:[#allocation40_spill]] %s4186_s11  ;;  %s490_s6 = int_to_ptr.hbm [resolvable:$true] %s489_s6 }
  0x3f   : > { %2698 = dma.hbm_to_vmem [thread:$0]  (!%p3425_p0), %s490_s6, 16, %s492_s7, %s4065_s28  }
  0x40   : > { %s2670_s6 = smul.u32 3, %s3453_s14  ;;  %s3457_s7 = sshll.u32 %s3453_s14, 6 }
  0x41   : > { %s4188_s27 = smov (!%p52_p7, %s4127_s27), %s3226_s22  ;;  %s110_s29 = ssub.s32 %s3222_s21, %s4186_s11 }
  0x42   : > { %p56_p8 = scmp.ge.s32.totalorder %s4188_s27, 2  ;;  %p111_p9 = scmp.eq.s32.totalorder %s110_s29, 0 }
  0x43   : > { %s2671_s28 = smul.u32 3, %s3222_s21  ;;  %s524_s1 = scalar_lea.vmem [#allocation9], %s2670_s6 }
  0x44   : > { %s532_s23 = sshll.u32 %s524_s1, 4  ;;  %s4190_s27 = smov (%p56_p8, %s4188_s27), 0  ;;  %s533_s23 = int_to_ptr.vmem [resolvable:$true] %s532_s23 }
  0x45   : > { %4128 = sst [smem:[#allocation41_spill]] %s4190_s27  ;;  %s58_s30 = ssub.s32 %s3226_s22, %s4190_s27 }
  0x46   : > { %s3472_s26 = scalar_select %p111_p9, %s3198_s15, %s4129_s19  }
  0x47   : > { %s4131_s3 = sld [smem:[#allocation48_spill]]  ;;  %p59_p10 = scmp.eq.s32.totalorder %s58_s30, 0 }
  0x48   : > { %4130 = sst [smem:[#allocation42_spill]] %s3472_s26  ;;  %s4132_s1 = sadd.s32 1, %s3210_s18 }
  0x49   : > { %s3482_s6 = scalar_select %p59_p10, %s3210_s18, %s4132_s1  }
  0x4a   : > { %s4078_s29 = scalar_lea.sflag [#allocation10], %s3421_s25  ;;  %s3490_s19 = sshll.u32 %s3222_s21, 6 }
  0x4b   : > { %4133 = sst [smem:[#allocation43_spill]] %s3482_s6  ;;  %s4080_s1 = scalar_lea.sflag [#allocation13], %s3421_s25 }
  0x4c   : > { %s4134_s8 = sld [smem:[#allocation53_spill]]  ;;  %s3232_s27 = smov 64  }
  0x4d   : > { %s528_s11 = scalar_lea.hbm %s4131_s3, %s2671_s28  ;;  %s583_s28 = scalar_lea.vmem [#allocation12], %s3457_s7 }
  0x4e   : > { %s530_s17 = sshll.u32 %s528_s11, 4  ;;  %s591_s11 = sshll.u32 %s583_s28, 4  ;;  %s531_s17 = int_to_ptr.hbm [resolvable:$true] %s530_s17  ;;  %s592_s11 = int_to_ptr.vmem [resolvable:$true] %s591_s11 }
  0x4f   : > { %2704 = dma.hbm_to_vmem [thread:$0]  (!%p3441_p2), %s531_s17, 48, %s533_s23, %s4078_s29  }
  0x50   : > { %s3233_s6 = smov 4   ;;  %s2393_s17 = sshll.u32 %s3418_s16, 3 }
  0x51   : > { %s2394_s23 = sshll.u32 %s3226_s22, 3  ;;  %s4135_s0 = sld [smem:[#allocation45_spill]] }
  0x52   : > { %s588_s30 = scalar_lea.hbm %s4134_s8, %s3490_s19  ;;  %s466_s29 = scalar_lea.vmem [#allocation3], %s2393_s17 }
  0x53   : > { %s589_s3 = sshll.u32 %s588_s30, 4  ;;  %s474_s8 = sshll.u32 %s466_s29, 4  ;;  %s590_s3 = int_to_ptr.hbm [resolvable:$true] %s589_s3  ;;  %s475_s8 = int_to_ptr.vmem [resolvable:$true] %s474_s8 }
  0x54   : > { %2710 = dma.hbm_to_vmem [thread:$0]  (!%p3441_p2), %s590_s3, 1024, %s592_s11, %s4080_s1, %s3232_s27, %s3232_s27, %s3233_s6  }
  0x55   : > { %s463_s18 = scalar_lea.sflag [#allocation4], %s3418_s16  ;;  %s2668_s26 = smul.u32 192, %s3453_s14 }
  0x56   : > { %s2669_s3 = smul.u32 192, %s3222_s21  ;;  %s4136_s2 = sld [smem:[#allocation47_spill]] }
  0x57   : > { %s470_s30 = scalar_lea.hbm %s4135_s0, %s2394_s23  ;;  %s502_s20 = scalar_lea.vmem [#allocation8], %s2668_s26 }
  0x58   : > { %s472_s28 = sshll.u32 %s470_s30, 4  ;;  %s510_s17 = sshll.u32 %s502_s20, 4  ;;  %s473_s28 = int_to_ptr.hbm [resolvable:$true] %s472_s28  ;;  %s511_s17 = int_to_ptr.vmem [resolvable:$true] %s510_s17 }
  0x59   : > { %2695 = dma.hbm_to_vmem [thread:$0]  (!%p3425_p0), %s473_s28, 128, %s475_s8, %s463_s18  }
  0x5a   : > { %s4137_s4 = sld [smem:[#allocation49_spill]]  ;;  %s3234_s8 = smov 192  }
  0x5b   : > { %s3235_s16 = smov 12   ;;  %s4138_s18 = scalar_lea.sflag [#allocation7], %s3421_s25 }
  0x5c   : > { %s507_s23 = scalar_lea.hbm %s4136_s2, %s2669_s3  ;;  %s543_s26 = scalar_lea.vmem [#allocation11], %s3457_s7 }
  0x5d   : > { %s508_s29 = sshll.u32 %s507_s23, 4  ;;  %s551_s28 = sshll.u32 %s543_s26, 4  ;;  %s509_s29 = int_to_ptr.hbm [resolvable:$true] %s508_s29  ;;  %s552_s28 = int_to_ptr.vmem [resolvable:$true] %s551_s28 }
  0x5e   : > { %2701 = dma.hbm_to_vmem [thread:$0]  (!%p3441_p2), %s509_s29, 3072, %s511_s17, %s4138_s18, %s3234_s8, %s3234_s8, %s3235_s16  }
  0x5f   : > { %s4139_s3 = scalar_lea.sflag [#allocation10], %s3421_s25  ;;  %s4140_s10 = sld [smem:[#allocation55_spill]] }
  0x60   : > { %s548_s13 = scalar_lea.hbm %s4137_s4, %s3490_s19  ;;  %s611_s30 = scalar_lea.vmem [#allocation14], %s3457_s7 }
  0x61   : > { %s549_s1 = sshll.u32 %s548_s13, 4  ;;  %s619_s17 = sshll.u32 %s611_s30, 4  ;;  %s550_s1 = int_to_ptr.hbm [resolvable:$true] %s549_s1  ;;  %s620_s17 = int_to_ptr.vmem [resolvable:$true] %s619_s17 }
  0x62   : > { %2707 = dma.hbm_to_vmem [thread:$0]  (!%p3441_p2), %s550_s1, 1024, %s552_s28, %s4139_s3, %s3232_s27, %s3232_s27, %s3233_s6  }
  0x63   : > { %s4141_s29 = scalar_lea.sflag [#allocation13], %s3421_s25  ;;  %s4142_s12 = sld [smem:[#allocation57_spill]] }
  0x64   : > { %s638_s18 = scalar_lea.vmem [#allocation15], %s3453_s14 }
  0x65   : > { %s616_s20 = scalar_lea.hbm %s4140_s10, %s3490_s19  ;;  %s645_s1 = sshll.u32 %s638_s18, 4  ;;  %s646_s1 = int_to_ptr.vmem [resolvable:$true] %s645_s1 }
  0x66   : > { %s617_s24 = sshll.u32 %s616_s20, 4  ;;  %s636_s19 = scalar_lea.sflag [#allocation16], %s3453_s14  ;;  %s618_s24 = int_to_ptr.hbm [resolvable:$true] %s617_s24 }
  0x67   : > { %2713 = dma.hbm_to_vmem [thread:$0]  (!%p3441_p2), %s618_s24, 1024, %s620_s17, %s4141_s29, %s3232_s27, %s3232_s27, %s3233_s6  }
  0x68   : > { %660 = sbr.rel (%p3447_p6) target bundleno = 1897 (0x769), region = 76 }
  0x69   : > { %s641_s16 = scalar_lea.hbm %s4142_s12, %s3222_s21 }
  0x6a   : > { %s643_s26 = sshll.u32 %s641_s16, 4  ;;  %s644_s26 = int_to_ptr.hbm [resolvable:$true] %s643_s26 }
  0x6b   : > { %2716 = dma.hbm_to_vmem [thread:$0]  (!%p3441_p2), %s644_s26, 16, %s646_s1, %s636_s19  }
  0x6d   : > { %s4143_s7 = sld [smem:[#allocation28_spill]] }
  0x73   : > { %s3557_s3 = sand.u32 1, %s4143_s7  }
  0x74   : > { %s4081_s25 = sshll.u32 %s3557_s3, 3  ;;  %s663_s27 = scalar_lea.sflag [#allocation4], %s3557_s3 }
  0x75   : > { %s3563_s6 = scalar_lea.vmem [#allocation3], %s4081_s25 }
  0x76   : > { %3161 = dma.done.wait (%p3389_p5), %s663_s27, 128  }
  0x77   : > { %3163 = vsyncadd (%p3389_p5), %s663_s27, 4294967168  ;;  %s4145_s5 = sld [smem:[#allocation35_spill]] }
  0x7d   : > { %s672_s9 = sand.u32 1, %s4145_s5  }
  0x7e   : > { %s673_s14 = scalar_lea.sflag [#allocation7], %s672_s9 }
  0x7f   : > { %3165 = dma.done.wait (%p3389_p5), %s673_s14, 16  }
  0x80   : > { %3167 = vsyncadd (%p3389_p5), %s673_s14, 4294967280  ;;  %s4146_s23 = sld [smem:[#allocation25_spill]] }
  0x86   : > { %s3576_s24 = sand.u32 1, %s4146_s23  }
  0x87   : > { %4148 = sst [smem:[#allocation44_spill]] %s3576_s24  ;;  %s2672_s30 = smul.u32 192, %s3576_s24 }
  0x89   : > { %s3579_s17 = scalar_lea.vmem [#allocation8], %s2672_s30 }
  0x8a   : > { %3169 = dma.done.wait (%p3401_p11), %s673_s14, 3072  }
  0x8b   : > { %3171 = vsyncadd (%p3401_p11), %s673_s14, 4294964224  ;;  %s2673_s29 = smul.u32 3, %s3576_s24  ;;  %s692_s13 = scalar_lea.sflag [#allocation10], %s672_s9 }
  0x8d   : > { %s3586_s8 = scalar_lea.vmem [#allocation9], %s2673_s29 }
  0x8e   : > { %3173 = dma.done.wait (%p3401_p11), %s692_s13, 1072  }
  0x8f   : > { %3175 = vsyncadd (%p3401_p11), %s692_s13, 4294966224  ;;  %s2407_s16 = sshll.u32 %s3576_s24, 6  ;;  %s712_s1 = scalar_lea.sflag [#allocation13], %s672_s9 }
  0x90   : > { %s3593_s18 = scalar_lea.vmem [#allocation11], %s2407_s16  ;;  %s3595_s26 = scalar_lea.vmem [#allocation12], %s2407_s16 }
  0x91   : > { %3177 = dma.done.wait (%p3401_p11), %s712_s1, 2048  }
  0x92   : > { %3179 = vsyncadd (%p3401_p11), %s712_s1, 4294965248  ;;  %s3601_s19 = scalar_lea.vmem [#allocation14], %s2407_s16  ;;  %s732_s7 = scalar_lea.sflag [#allocation16], %s3576_s24 }
  0x93   : > { %3181 = dma.done.wait (%p3401_p11), %s732_s7, 16  }
  0x94   : > { %3183 = vsyncadd (%p3401_p11), %s732_s7, 4294967280  ;;  %s4149_s27 = sld [smem:[#allocation30_spill]]  ;;  %s4156_s30 = sshll.u32 %s3557_s3, 3 }
  0x95   : > { %s4151_s20 = sld [smem:[#allocation51_spill]]  ;;  %s3639_s24 = scalar_lea.vmem [#allocation17], %s4156_s30 }
  0x96   : > { %s4152_s28 = sld [smem:[#allocation52_spill]] }
  0x97   : > { %s4153_s2 = sld [smem:[#allocation54_spill]] }
  0x98   : > { %s4154_s14 = sld [smem:[#allocation56_spill]] }
  0x99   : > { %s4155_s15 = sld [smem:[#allocation58_spill]] }
  0x9a   : > { %p831_p5 = scmp.lt.s32.totalorder %s4149_s27, 1  ;;  %p2411_p11 = scmp.ne.s32.totalorder %s4149_s27, 0 }
  0x9c   : > { %s3611_s5 = scalar_select %p831_p5, %s4149_s27, 1 }
  0x9d   : > { %853 = sbr.rel (%p2411_p11) target bundleno = 164 (0xa4), region = 112 }
  0x9e   : > { %s836_s16 = scalar_lea.vmem %s4151_s20, %s3611_s5  ;;  %s839_s11 = scalar_lea.vmem %s4152_s28, %s3611_s5 }
  0x9f   : > { %s842_s4 = scalar_lea.vmem %s4153_s2, %s3611_s5  ;;  %s845_s12 = scalar_lea.vmem %s4154_s14, %s3611_s5 }
  0xa0   : > { %s848_s23 = scalar_lea.vmem %s4155_s15, %s3611_s5 }
  0xa2   : > { %v854_v0 = vld [vmem:[%s3563_s6] sm:$0xff] }
  0xa3   : > { %855 = vst [vmem:[#allocation2] sm:$0xff] %v854_v0 }
  0xa4 PF: > { %v2641_v1 = vld [vmem:[%s3579_s17 + $0xac] sm:$0xf]  ;;  %v2500_v2 = vld [vmem:[%s3579_s17 + $0xb4] sm:$0xf0]  ;;  %v2498_v3 = vld [vmem:[%s3579_s17 + $0xa8] sm:$0xf] }
  0xa5   : > { %v2503_v4 = vor.u32 %v2641_v1, %v2500_v2  ;;  %v2642_v5 = vld [vmem:[%s3579_s17 + $0xb0] sm:$0xf0]  ;;  %v2488_v7 = vld [vmem:[%s3579_s17 + $0x9c] sm:$0xf0]  ;;  %v2486_v9 = vld [vmem:[%s3579_s17 + $0x90] sm:$0xf] }
  0xa6   : > { %v2638_v6 = vld [vmem:[%s3579_s17 + $0x94] sm:$0xf]  ;;  %v2499_v8 = vor.u32 %v2642_v5, %v2498_v3  ;;  %v2639_v10 = vld [vmem:[%s3579_s17 + $0x98] sm:$0xf0]  ;;  %v2476_v14 = vld [vmem:[%s3579_s17 + $0x84] sm:$0xf0] }
  0xa7   : > { %1040 = vmatpush.bf16.msra.mxu1 %v2503_v4  ;;  %v2491_v11 = vor.u32 %v2638_v6, %v2488_v7  ;;  %v2487_v12 = vor.u32 %v2639_v10, %v2486_v9  ;;  %v2635_v13 = vld [vmem:[%s3579_s17 + $0x7c] sm:$0xf]  ;;  %v2474_v15 = vld [vmem:[%s3579_s17 + $0x78] sm:$0xf]  ;;  %v2636_v16 = vld [vmem:[%s3579_s17 + $0x80] sm:$0xf0] }
  0xa8   : > { %1027 = vmatpush.bf16.msra.mxu0 %v2499_v8  ;;  %v2479_v17 = vor.u32 %v2635_v13, %v2476_v14  ;;  %v2475_v18 = vor.u32 %v2636_v16, %v2474_v15  ;;  %v2632_v19 = vld [vmem:[%s3579_s17 + $0x64] sm:$0xf]  ;;  %v2464_v20 = vld [vmem:[%s3579_s17 + $0x6c] sm:$0xf0]  ;;  %v2462_v21 = vld [vmem:[%s3579_s17 + $0x60] sm:$0xf] }
  0xa9   : > { %v2633_v22 = vld [vmem:[%s3579_s17 + $0x68] sm:$0xf0]  ;;  %v2452_v24 = vld [vmem:[%s3579_s17 + $0x54] sm:$0xf0]  ;;  %v2467_v25 = vor.u32 %v2632_v19, %v2464_v20  ;;  %v2450_v26 = vld [vmem:[%s3579_s17 + $0x48] sm:$0xf] }
  0xaa   : > { %v2629_v23 = vld [vmem:[%s3579_s17 + $0x4c] sm:$0xf]  ;;  %v2463_v27 = vor.u32 %v2633_v22, %v2462_v21  ;;  %v2630_v28 = vld [vmem:[%s3579_s17 + $0x50] sm:$0xf0]  ;;  %v2440_v32 = vld [vmem:[%s3579_s17 + $0x3c] sm:$0xf0] }
  0xab   : > { %1041 = vmatpush.bf16.msra.mxu1 %v2491_v11  ;;  %v2455_v29 = vor.u32 %v2629_v23, %v2452_v24  ;;  %v2451_v30 = vor.u32 %v2630_v28, %v2450_v26  ;;  %v2626_v31 = vld [vmem:[%s3579_s17 + $0x34] sm:$0xf]  ;;  %v2438_v33 = vld [vmem:[%s3579_s17 + $0x30] sm:$0xf]  ;;  %v2627_v34 = vld [vmem:[%s3579_s17 + $0x38] sm:$0xf0] }
  0xac   : > { %1028 = vmatpush.bf16.msra.mxu0 %v2487_v12  ;;  %v2443_v35 = vor.u32 %v2626_v31, %v2440_v32  ;;  %v2439_v36 = vor.u32 %v2627_v34, %v2438_v33  ;;  %v2623_v37 = vld [vmem:[%s3579_s17 + $0x1c] sm:$0xf]  ;;  %v2428_v38 = vld [vmem:[%s3579_s17 + $0x24] sm:$0xf0]  ;;  %v2426_v39 = vld [vmem:[%s3579_s17 + $0x18] sm:$0xf] }
  0xad   : > { %v2624_v40 = vld [vmem:[%s3579_s17 + $0x20] sm:$0xf0]  ;;  %v2431_v41 = vor.u32 %v2623_v37, %v2428_v38  ;;  %v2416_v44 = vld [vmem:[%s3579_s17 + $0xc] sm:$0xf0]  ;;  %v2414_v45 = vld [vmem:[%s3579_s17] sm:$0xf] }
  0xae   : > { %v2427_v42 = vor.u32 %v2624_v40, %v2426_v39  ;;  %v2620_v43 = vld [vmem:[%s3579_s17 + $0x4] sm:$0xf]  ;;  %v2621_v46 = vld [vmem:[%s3579_s17 + $0x8] sm:$0xf0]  ;;  %s3236_s0 = smov 96   ;;  %s3237_s2 = smov 64  }
  0xaf   : > { %1042 = vmatpush.bf16.msra.mxu1 %v2479_v17  ;;  %v2419_v47 = vor.u32 %v2620_v43, %v2416_v44  ;;  %v3675_v48 = vld [vmem:[#allocation2] sm:$0xff]  ;;  %v2415_v49 = vor.u32 %v2621_v46, %v2414_v45  ;;  %v3684_v51 = vld [vmem:[%s3586_s8] sm:$0x7]  ;;  %s3238_s10 = smov 32   ;;  %v3239_v63 = vmov 1983009808  }
  0xb0   : > { %1029 = vmatpush.bf16.msra.mxu0 %v2475_v18  ;;  %v3679_v50 = vpack.c.bf16 %v3675_v48, %v3675_v48  ;;  %v894_v52 = vperm.slane %v3684_v51, 1  ;;  %v893_v53 = vperm.slane %v3684_v51, 0  ;;  %v1083_v0 = vunpack.c.l.s4 %v3239_v63  ;;  %v2506_v20 = vld [vmem:[%s3579_s17 + $0xb0] sm:$0xf]  ;;  %v2643_v21 = vld [vmem:[%s3579_s17 + $0xb8] sm:$0xf0] }
  0xb1   : > { %vm1078_vm0 = vcmask 1047556   ;;  %v3240_v12 = vmov 1934713408   ;;  %v2494_v38 = vld [vmem:[%s3579_s17 + $0x98] sm:$0xf]  ;;  %vm1443_vm1 = vcmask 261120  }
  0xb2   : > { %v3694_v7 = vunpack.c.0.s8 %v1083_v0  ;;  %v1107_v13 = vunpack.c.l.s4 %v3240_v12  ;;  %v2640_v39 = vld [vmem:[%s3579_s17 + $0xa0] sm:$0xf0]  ;;  %s4157_s15 = scalar_lea.vmem [#allocation6], %s3557_s3  ;;  %vm1520_vm2 = vcmask 64512   ;;  %vm1572_vm3 = vcmask 1043456   ;;  %s4158_s25 = sld [smem:[#allocation50_spill]] }
  0xb3   : > { %1043 = vmatpush.bf16.msra.mxu1 %v2467_v25  ;;  %v2507_v25 = vor.u32 %v2643_v21, %v2506_v20  ;;  %vm1769_vm4 = vcmask 523264   ;;  %vm1771_vm5 = vcmask 785408   ;;  %s4167_s9 = sld [smem:[#allocation30_spill]] }
  0xb4   : > { %1030 = vmatpush.bf16.msra.mxu0 %v2463_v27  ;;  %v3706_v22 = vunpack.c.0.s8 %v1107_v13 }
  0xb5   : > { %1053 = vmatpush.bf16.msra.mxu2 %v2507_v25 }
  0xb7   : > { %1044 = vmatpush.bf16.msra.mxu1 %v2455_v29 }
  0xb8   : > { %1031 = vmatpush.bf16.msra.mxu0 %v2451_v30  ;;  %s4159_s6 = scalar_lea.vmem %s4158_s25, %s3611_s5 }
  0xb9   : > { %p2612_p1 = scmp.ne.s32.totalorder %s4167_s9, 1 }
  0xbb   : > { %1045 = vmatpush.bf16.msra.mxu1 %v2443_v35 }
  0xbc   : > { %1032 = vmatpush.bf16.msra.mxu0 %v2439_v36 }
  0xbf   : > { %1046 = vmatpush.bf16.msra.mxu1 %v2431_v41 }
  0xc0   : > { %1033 = vmatpush.bf16.msra.mxu0 %v2427_v42 }
  0xc3   : > { %1047 = vmatpush.bf16.msra.mxu1 %v2419_v47  ;;  %v2495_v47 = vor.u32 %v2640_v39, %v2494_v38 }
  0xc4   : > { %1034 = vmatpush.bf16.msra.mxu0 %v2415_v49 }
  0xc5   : > { %1054 = vmatpush.bf16.msra.mxu2 %v2495_v47  ;;  %v2482_v47 = vld [vmem:[%s3579_s17 + $0x80] sm:$0xf] }
  0xc6   : > { %1048 = vmatmul.bf16.vlgmr.msra.gmra.mxu1 %v3679_v50 }
  0xc7   : > { %1035 = vmatmul.bf16.vlgmr.msra.gmra.mxu0 %v3679_v50 }
 0x143   : > { %v1049_v54 = vpop.f32.mrf.mxu1 }
 0x144   : > { %v1050_v55 = vadd.f32 %v1049_v54, %v894_v52  ;;  %v1036_v56 = vpop.f32.mrf.mxu0 }
 0x145   : > { %v1037_v57 = vadd.f32 %v1036_v56, %v893_v53 }
 0x146   : > { %1193 = vrot.lane.b32.xlu1 %v1050_v55, %s3236_s0  ;;  %1196 = vrot.lane.b32.xlu0 %v1050_v55, %s3237_s2  ;;  %v1204_v6 = vrot.slane %v1050_v55, 4 }
 0x147   : > { %v1066_v58 = vmul.f32 0.35355338, %v1037_v57 }
 0x149   : > { %1074 = vrot.lane.b32.xlu2 %v1066_v58, %s3238_s10  ;;  %v1080_v19 = vrot.slane %v1066_v58, 4 }
 0x14b   : > { %v1051_v59 = vpop.f32.mrf.mxu1 }
 0x14c   : > { %v1038_v60 = vpop.f32.mrf.mxu0 }
 0x14e   : > { %1199 = vrot.lane.b32.xlu0 %v1050_v55, %s3238_s10  ;;  %1071 = vrot.lane.b32.xlu1 %v1066_v58, %s3237_s2 }
 0x151   : > { %1068 = vrot.lane.b32.xlu2 %v1066_v58, %s3236_s0 }
 0x1a3   : > { %v1075_v61 = vpop.permute.xlu2 %1074 }
 0x1a4   : > { %v1090_v1 = vrot.slane %v1075_v61, 4 }
 0x1ab   : > { %v1069_v62 = vpop.permute.xlu2 %1068 }
 0x1ac   : > { %v1092_v2 = vrot.slane %v1069_v62, 4  ;;  %v1091_v8 = vsel %vm1078_vm0, %v1090_v1, %v1069_v62 }
 0x1ad   : > { %v1097_v14 = vperm.slane %v1091_v8, %v3694_v7 }
 0x1ae   : > { %v1093_v10 = vsel %vm1078_vm0, %v1075_v61, %v1092_v2 }
 0x1af   : > { %v1101_v16 = vperm.slane %v1093_v10, %v3694_v7  ;;  %v1102_v30 = vrot.slane %v1097_v14, 4 }
 0x1b1   : > { %v1114_v34 = vrot.slane %v1101_v16, 4 }
 0x1b8   : > { %v1194_v3 = vpop.permute.xlu1 %1193  ;;  %v1197_v4 = vpop.permute.xlu0 %1196 }
 0x1b9   : > { %v1202_v5 = vrot.slane %v1197_v4, 4  ;;  %v1205_v9 = vsel %vm1078_vm0, %v1197_v4, %v1204_v6  ;;  %v1216_v17 = vrot.slane %v1194_v3, 4 }
 0x1ba   : > { %v1213_v15 = vperm.slane %v1205_v9, %v3694_v7 }
 0x1bb   : > { %v1203_v11 = vsel %vm1078_vm0, %v1202_v5, %v1050_v55 }
 0x1bc   : > { %v1209_v18 = vperm.slane %v1203_v11, %v3694_v7  ;;  %v1240_v31 = vrot.slane %v1213_v15, 4 }
 0x1be   : > { %v1228_v35 = vrot.slane %v1209_v18, 4 }
 0x1c0   : > { %v1200_v23 = vpop.permute.xlu0 %1199  ;;  %v1072_v24 = vpop.permute.xlu1 %1071 }
 0x1c1   : > { %v1214_v26 = vrot.slane %v1200_v23, 4  ;;  %v1217_v27 = vsel %vm1078_vm0, %v1200_v23, %v1216_v17  ;;  %v1077_v28 = vrot.slane %v1072_v24, 4  ;;  %v1081_v29 = vsel %vm1078_vm0, %v1072_v24, %v1080_v19 }
 0x1c2   : > { %v1225_v32 = vperm.slane %v1217_v27, %v3694_v7  ;;  %v1089_v33 = vperm.slane %v1081_v29, %v3694_v7 }
 0x1c3   : > { %v1215_v36 = vsel %vm1078_vm0, %v1214_v26, %v1194_v3  ;;  %v1079_v37 = vsel %vm1078_vm0, %v1077_v28, %v1066_v58 }
 0x1c4   : > { %v1221_v40 = vperm.slane %v1215_v36, %v3694_v7  ;;  %v1238_v41 = vrot.slane %v1225_v32, 4  ;;  %v1241_v42 = vsel %vm1078_vm0, %v1225_v32, %v1240_v31  ;;  %v1085_v43 = vperm.slane %v1079_v37, %v3694_v7 }
 0x1c5   : > { %v1249_v44 = vperm.slane %v1241_v42, %v3706_v22  ;;  %v1115_v45 = vsel %vm1078_vm0, %v1114_v34, %v1089_v33  ;;  %v1116_v46 = vrot.slane %v1089_v33, 4 }
 0x1c6   : > { %v1226_v49 = vrot.slane %v1221_v40, 4  ;;  %v1229_v52 = vsel %vm1078_vm0, %v1221_v40, %v1228_v35  ;;  %v1239_v53 = vsel %vm1078_vm0, %v1238_v41, %v1213_v15  ;;  %v1103_v54 = vsel %vm1078_vm0, %v1102_v30, %v1085_v43 }
 0x1c7   : > { %v1237_v55 = vperm.slane %v1229_v52, %v3706_v22  ;;  %v1245_v56 = vperm.slane %v1239_v53, %v3706_v22  ;;  %v1256_v57 = vrot.slane %v1249_v44, 4  ;;  %v1104_v58 = vrot.slane %v1085_v43, 4 }
 0x1c8   : > { %v1227_v59 = vsel %vm1078_vm0, %v1226_v49, %v1209_v18  ;;  %v1109_v60 = vperm.slane %v1103_v54, %v3706_v22  ;;  %v1117_v61 = vsel %vm1078_vm0, %v1101_v16, %v1116_v46  ;;  %v1121_v62 = vperm.slane %v1115_v45, %v3706_v22  ;;  %v2637_v49 = vld [vmem:[%s3579_s17 + $0x88] sm:$0xf0] }
 0x1c9   : > { %v1233_v63 = vperm.slane %v1227_v59, %v3706_v22  ;;  %v1252_v0 = vrot.slane %v1237_v55, 4  ;;  %v1254_v1 = vrot.slane %v1245_v56, 4  ;;  %v1257_v2 = vsel %vm1078_vm0, 0.0, %v1256_v57 }
 0x1ca   : > { %v1274_v3 = vrot.slane %v1257_v2, 4  ;;  %v1105_v4 = vsel %vm1078_vm0, %v1097_v14, %v1104_v58  ;;  %v1125_v5 = vperm.slane %v1117_v61, %v3706_v22  ;;  %v1269_v10 = vsel %vm1078_vm0, %v1256_v57, %v1245_v56 }
 0x1cb   : > { %v1250_v6 = vrot.slane %v1233_v63, 4  ;;  %v1253_v8 = vsel %vm1078_vm0, 0.0, %v1252_v0  ;;  %v1255_v9 = vsel %vm1078_vm0, 0.0, %v1254_v1  ;;  %v1113_v13 = vperm.slane %v1105_v4, %v3706_v22  ;;  %v2470_v4 = vld [vmem:[%s3579_s17 + $0x68] sm:$0xf] }
 0x1cc   : > { %v1263_v11 = vrot.slane %v1253_v8, 4  ;;  %v1275_v12 = vsel %vm1078_vm0, %v1274_v3, %v1255_v9  ;;  %v1126_v15 = vrot.slane %v1109_v60, 4  ;;  %v1130_v17 = vrot.slane %v1121_v62, 4 }
 0x1cd   : > { %v1279_v16 = vperm.slane %v1275_v12, %v3694_v7  ;;  %v1132_v18 = vrot.slane %v1125_v5, 4  ;;  %v1251_v14 = vsel %vm1078_vm0, 0.0, %v1250_v6  ;;  %v1273_v19 = vperm.slane %v1269_v10, %v3694_v7  ;;  %v2634_v5 = vld [vmem:[%s3579_s17 + $0x70] sm:$0xf0] }
 0x1ce   : > { %v1128_v20 = vrot.slane %v1113_v13, 4  ;;  %v1258_v21 = vsel %vm1078_vm0, %v1252_v0, %v1233_v63  ;;  %v1264_v23 = vsel %vm1078_vm0, %v1263_v11, %v1251_v14  ;;  %v1127_v27 = vsel %vm1078_vm0, 0.0, %v1126_v15 }
 0x1cf   : > { %v1133_v24 = vsel %vm1078_vm0, 0.0, %v1132_v18  ;;  %v1145_v25 = vsel %vm1078_vm0, %v1132_v18, %v1121_v62  ;;  %v1262_v26 = vperm.slane %v1258_v21, %v3694_v7  ;;  %v1131_v29 = vsel %vm1078_vm0, 0.0, %v1130_v17  ;;  %v2631_v17 = vld [vmem:[%s3579_s17 + $0x58] sm:$0xf0] }
 0x1d0   : > { %v1129_v28 = vsel %vm1078_vm0, 0.0, %v1128_v20  ;;  %v1150_v30 = vrot.slane %v1133_v24, 4  ;;  %v1268_v32 = vperm.slane %v1264_v23, %v3694_v7  ;;  %v1292_v34 = vrot.slane %v1279_v16, 4 }
 0x1d1   : > { %v1139_v31 = vrot.slane %v1129_v28, 4  ;;  %v1282_v33 = vrot.slane %v1262_v26, 4  ;;  %v1134_v35 = vsel %vm1078_vm0, %v1128_v20, %v1109_v60  ;;  %v3753_v36 = vperm.slane %v1145_v25, %v3694_v7  ;;  %v2628_v28 = vld [vmem:[%s3579_s17 + $0x40] sm:$0xf0] }
 0x1d2   : > { %v1151_v37 = vsel %vm1078_vm0, %v1150_v30, %v1131_v29  ;;  %v1294_v38 = vrot.slane %v1273_v19, 4  ;;  %v1280_v41 = vrot.slane %v1268_v32, 4  ;;  %v1293_v42 = vsel %vm1078_vm0, %v1292_v34, %v1273_v19  ;;  %v2434_v34 = vld [vmem:[%s3579_s17 + $0x20] sm:$0xf] }
 0x1d3   : > { %v1140_v39 = vsel %vm1078_vm0, %v1139_v31, %v1127_v27  ;;  %v3758_v40 = vperm.slane %v1151_v37, %v3694_v7  ;;  %v1299_v43 = vperm.slane %v1293_v42, %v3706_v22  ;;  %v1283_v44 = vsel %vm1078_vm0, %v1268_v32, %v1282_v33  ;;  %v2446_v27 = vld [vmem:[%s3579_s17 + $0x38] sm:$0xf] }
 0x1d4   : > { %v1295_v45 = vsel %vm1078_vm0, %v1279_v16, %v1294_v38  ;;  %v1144_v46 = vperm.slane %v1140_v39, %v3694_v7  ;;  %v1281_v53 = vsel %vm1078_vm0, %v1280_v41, %v1262_v26  ;;  %v1291_v54 = vperm.slane %v1283_v44, %v3706_v22  ;;  %v2458_v16 = vld [vmem:[%s3579_s17 + $0x50] sm:$0xf] }
 0x1d5   : > { %v1168_v52 = vrot.slane %v3758_v40, 4  ;;  %v1303_v55 = vperm.slane %v1295_v45, %v3706_v22  ;;  %v1287_v56 = vperm.slane %v1281_v53, %v3706_v22  ;;  %v1304_v57 = vrot.slane %v1299_v43, 4 }
 0x1d6   : > { %v1138_v58 = vperm.slane %v1134_v35, %v3694_v7  ;;  %v1156_v59 = vrot.slane %v1144_v46, 4  ;;  %v1310_v60 = vrot.slane %v1291_v54, 4  ;;  %v2483_v63 = vor.u32 %v2637_v49, %v2482_v47  ;;  %v2625_v35 = vld [vmem:[%s3579_s17 + $0x28] sm:$0xf0] }
 0x1d7   : > { %v1308_v61 = vrot.slane %v1303_v55, 4  ;;  %v1169_v62 = vsel %vm1078_vm0, %v1168_v52, %v3753_v36  ;;  %v1305_v0 = vsel %vm1078_vm0, %v1304_v57, %v1287_v56  ;;  %v1306_v1 = vrot.slane %v1287_v56, 4 }
 0x1d8   : > { %v1157_v2 = vsel %vm1078_vm0, %v1156_v59, %v1138_v58  ;;  %v1175_v3 = vperm.slane %v1169_v62, %v3706_v22  ;;  %v1312_v6 = vpack.c.bf16 %v1305_v0, %v1305_v0  ;;  %v1311_v8 = vsel %vm1078_vm0, %v1303_v55, %v1310_v60  ;;  %1055 = vmatpush.bf16.msra.mxu2 %v2483_v63 }
 0x1d9   : > { %v1309_v9 = vsel %vm1078_vm0, %v1308_v61, %v1291_v54  ;;  %v1163_v10 = vperm.slane %v1157_v2, %v3706_v22  ;;  %v1315_v11 = vpack.c.bf16 %v1311_v8, %v1311_v8  ;;  %v1307_v12 = vsel %vm1078_vm0, %v1299_v43, %v1306_v1  ;;  %v2622_v43 = vld [vmem:[%s3579_s17 + $0x10] sm:$0xf0]  ;;  %v2820_v54 = vld [vmem:[%s4157_s15] ss:$0 sm:$0xff] }
 0x1da   : > { %v1314_v13 = vpack.c.bf16 %v1309_v9, %v1309_v9  ;;  %v1180_v15 = vrot.slane %v1175_v3, 4  ;;  %v1448_v18 = vsel %vm1443_vm1, %v1312_v6, 0  ;;  %v1313_v14 = vpack.c.bf16 %v1307_v12, %v1307_v12 }
 0x1db   : > { %v2471_v19 = vor.u32 %v2634_v5, %v2470_v4  ;;  %1457 = vmatpush.bf16.xpose.msrb.mxu0 %v1448_v18  ;;  %v1505_v20 = vsel %vm1443_vm1, %v1315_v11, 0  ;;  %v1182_v21 = vrot.slane %v1163_v10, 4  ;;  %v2459_v24 = vor.u32 %v2631_v17, %v2458_v16 }
 0x1dc   : > { %v1467_v23 = vsel %vm1443_vm1, %v1313_v14, 0  ;;  %v1486_v25 = vsel %vm1443_vm1, %v1314_v13, 0  ;;  %v1181_v26 = vsel %vm1078_vm0, %v1180_v15, %v1163_v10  ;;  %v1158_v29 = vrot.slane %v1138_v58, 4 }
 0x1dd   : > { %1056 = vmatpush.bf16.msra.mxu2 %v2471_v19  ;;  %1476 = vmatpush.bf16.xpose.msra.mxu3 %v1467_v23  ;;  %v1183_v30 = vsel %vm1078_vm0, %v1175_v3, %v1182_v21  ;;  %v1170_v31 = vrot.slane %v3753_v36, 4  ;;  %v1188_v32 = vpack.c.bf16 %v1181_v26, %v1181_v26  ;;  %v2447_v33 = vor.u32 %v2628_v28, %v2446_v27  ;;  %v2422_v36 = vld [vmem:[%s3579_s17 + $0x8] sm:$0xf] }
 0x1de   : > { %v1189_v37 = vpack.c.bf16 %v1183_v30, %v1183_v30  ;;  %v1159_v38 = vsel %vm1078_vm0, %v1144_v46, %v1158_v29  ;;  %v2435_v41 = vor.u32 %v2625_v35, %v2434_v34  ;;  %v2423_v45 = vor.u32 %v2622_v43, %v2422_v36 }
 0x1df   : > { %v1171_v39 = vsel %vm1078_vm0, %v3758_v40, %v1170_v31  ;;  %v1167_v42 = vperm.slane %v1159_v38, %v3706_v22  ;;  %v895_v8 = vperm.slane %v3684_v51, 2 }
 0x1e0   : > { %v1179_v44 = vperm.slane %v1171_v39, %v3706_v22 }
 0x1e1   : > { %1057 = vmatpush.bf16.msra.mxu2 %v2459_v24  ;;  %v1186_v47 = vrot.slane %v1167_v42, 4 }
 0x1e2   : > { %2508 = vmatmul.msk.bf16.vlgmr.msrb.gmra.mxu0 %vm1443_vm1, %v1188_v32  ;;  %v1184_v49 = vrot.slane %v1179_v44, 4 }
 0x1e3   : > { %1514 = vmatpush.bf16.xpose.msra.mxu0 %v1505_v20  ;;  %v1187_v46 = vsel %vm1078_vm0, %v1179_v44, %v1186_v47 }
 0x1e4   : > { %2509 = vmatmul.msk.bf16.vlgmr.msra.gmra.mxu3 %vm1443_vm1, %v1189_v37  ;;  %v1185_v52 = vsel %vm1078_vm0, %v1184_v49, %v1167_v42  ;;  %v1191_v40 = vpack.c.bf16 %v1187_v46, %v1187_v46 }
 0x1e5   : > { %1495 = vmatpush.bf16.xpose.msrb.mxu3 %v1486_v25  ;;  %1058 = vmatpush.bf16.msra.mxu2 %v2447_v33  ;;  %v1190_v53 = vpack.c.bf16 %v1185_v52, %v1185_v52 }
 0x1e9   : > { %1059 = vmatpush.bf16.msra.mxu2 %v2435_v41 }
 0x1ed   : > { %1060 = vmatpush.bf16.msra.mxu2 %v2423_v45 }
 0x1f0   : > { %1061 = vmatmul.bf16.vlgmr.msra.gmra.mxu2 %v3679_v50 }
 0x1f2   : > { %2511 = vmatmul.msk.bf16.vlgmr.msra.gmra.mxu0 %vm1443_vm1, %v1191_v40 }
 0x1f4   : > { %2510 = vmatmul.msk.bf16.vlgmr.msrb.gmra.mxu3 %vm1443_vm1, %v1190_v53 }
 0x25f   : > { %v1459_v55 = vpop.f32.mrf.mxu0 }
 0x260   : > { %v1460_v56 = vadd.f32 %v2820_v54, %v1459_v55 }
 0x262   : > { %v1521_v57 = vsel %vm1520_vm2, %v1460_v56, -inf }
 0x263   : > { %1522 = vmax.xlane.f32.xlu2 %v1521_v57 }
 0x267   : > { %v1461_v58 = vpop.f32.mrf.mxu0  ;;  %v1478_v59 = vpop.f32.mrf.mxu3 }
 0x268   : > { %v1479_v60 = vadd.f32 %v2820_v54, %v1478_v59 }
 0x26a   : > { %v1524_v61 = vsel %vm1520_vm2, %v1479_v60, -inf }
 0x26b   : > { %1525 = vmax.xlane.f32.xlu1 %v1524_v61 }
 0x26f   : > { %v1480_v50 = vpop.f32.mrf.mxu3  ;;  %v1516_v62 = vpop.f32.mrf.mxu0 }
 0x270   : > { %v1517_v63 = vadd.f32 %v2820_v54, %v1516_v62 }
 0x272   : > { %v1530_v0 = vsel %vm1520_vm2, %v1517_v63, -inf }
 0x273   : > { %v1062_v1 = vpop.f32.mrf.mxu2  ;;  %1531 = vmax.xlane.f32.xlu2 %v1530_v0 }
 0x274   : > { %v1063_v10 = vadd.f32 %v1062_v1, %v895_v8 }
 0x276   : > { %v1328_v32 = vrot.slane %v1063_v10, 4 }
 0x277   : > { %v1497_v2 = vpop.f32.mrf.mxu3  ;;  %v1518_v3 = vpop.f32.mrf.mxu0 }
 0x278   : > { %v1498_v4 = vadd.f32 %v2820_v54, %v1497_v2 }
 0x27a   : > { %v1527_v5 = vsel %vm1520_vm2, %v1498_v4, -inf }
 0x27b   : > { %v1064_v6 = vpop.f32.mrf.mxu2  ;;  %1528 = vmax.xlane.f32.xlu0 %v1527_v5 }
 0x27f   : > { %v1499_v9 = vpop.f32.mrf.mxu3 }
 0x284   : > { %1320 = vrot.lane.b32.xlu1 %v1063_v10, %s3237_s2 }
 0x28b   : > { %1323 = vrot.lane.b32.xlu2 %v1063_v10, %s3238_s10 }
 0x28f   : > { %1317 = vrot.lane.b32.xlu0 %v1063_v10, %s3236_s0 }
 0x2d6   : > { %v1523_v11 = vpop.xlane.xlu2 %1522 }
 0x2d7   : > { %v1533_v12 = vsub.f32 %v1460_v56, %v1523_v11 }
 0x2d9   : > { %v1537_v13 = vmul.f32 1.442695, %v1533_v12 }
 0x2db   : > { %2828 = vpow2.f32 %v1537_v13 }
 0x2de   : > { %v1526_v15 = vpop.xlane.xlu1 %1525 }
 0x2df   : > { %v1534_v16 = vsub.f32 %v1479_v60, %v1526_v15 }
 0x2e1   : > { %v3821_v17 = vpop.eup %2828  ;;  %v1539_v18 = vmul.f32 1.442695, %v1534_v16 }
 0x2e2   : > { %v1545_v51 = vsel %vm1520_vm2, %v3821_v17, 0.0 }
 0x2e3   : > { %2830 = vpow2.f32 %v1539_v18  ;;  %1546 = vadd.xlane.f32.xlu2 %v1545_v51 }
 0x2e6   : > { %v1532_v20 = vpop.xlane.xlu2 %1531 }
 0x2e7   : > { %v1536_v24 = vsub.f32 %v1517_v63, %v1532_v20 }
 0x2e9   : > { %v3825_v14 = vpop.eup %2830  ;;  %v1543_v26 = vmul.f32 1.442695, %v1536_v24 }
 0x2ea   : > { %v1548_v19 = vsel %vm1520_vm2, %v3825_v14, 0.0 }
 0x2eb   : > { %1549 = vadd.xlane.f32.xlu1 %v1548_v19 }
 0x2ee   : > { %v1529_v21 = vpop.xlane.xlu0 %1528  ;;  %v1324_v31 = vpop.permute.xlu2 %1323 }
 0x2ef   : > { %v1535_v23 = vsub.f32 %v1498_v4, %v1529_v21  ;;  %v1338_v35 = vrot.slane %v1324_v31, 4 }
 0x2f1   : > { %v1541_v25 = vmul.f32 1.442695, %v1535_v23 }
 0x2f3   : > { %2832 = vpow2.f32 %v1541_v25 }
 0x2f4   : > { %2834 = vpow2.f32 %v1543_v26 }
 0x2f6   : > { %v1321_v27 = vpop.permute.xlu1 %1320 }
 0x2f7   : > { %v1326_v28 = vrot.slane %v1321_v27, 4  ;;  %v1329_v34 = vsel %vm1078_vm0, %v1321_v27, %v1328_v32 }
 0x2f8   : > { %v1337_v39 = vperm.slane %v1329_v34, %v3694_v7 }
 0x2f9   : > { %v3829_v29 = vpop.eup %2832  ;;  %v1327_v33 = vsel %vm1078_vm0, %v1326_v28, %v1063_v10 }
 0x2fa   : > { %v1551_v30 = vsel %vm1520_vm2, %v3829_v29, 0.0  ;;  %v3835_v37 = vpop.eup %2834  ;;  %v1333_v38 = vperm.slane %v1327_v33, %v3694_v7  ;;  %v1364_v49 = vrot.slane %v1337_v39, 4 }
 0x2fb   : > { %1552 = vadd.xlane.f32.xlu0 %v1551_v30  ;;  %v1554_v43 = vsel %vm1520_vm2, %v3835_v37, 0.0 }
 0x2fc   : > { %v1352_v44 = vrot.slane %v1333_v38, 4 }
 0x301   : > { %v1318_v41 = vpop.permute.xlu0 %1317 }
 0x302   : > { %v1339_v42 = vsel %vm1078_vm0, %v1338_v35, %v1318_v41  ;;  %v1340_v36 = vrot.slane %v1318_v41, 4 }
 0x303   : > { %v1345_v45 = vperm.slane %v1339_v42, %v3694_v7  ;;  %1555 = vadd.xlane.f32.xlu0 %v1554_v43 }
 0x304   : > { %v1341_v47 = vsel %vm1078_vm0, %v1324_v31, %v1340_v36 }
 0x305   : > { %v1349_v46 = vperm.slane %v1341_v47, %v3694_v7  ;;  %v1350_v52 = vrot.slane %v1345_v45, 4  ;;  %v1353_v40 = vsel %vm1078_vm0, %v1345_v45, %v1352_v44 }
 0x306   : > { %v1361_v53 = vperm.slane %v1353_v40, %v3706_v22 }
 0x307   : > { %v1351_v54 = vsel %vm1078_vm0, %v1350_v52, %v1333_v38  ;;  %v1362_v55 = vrot.slane %v1349_v46, 4  ;;  %v1365_v56 = vsel %vm1078_vm0, %v1349_v46, %v1364_v49 }
 0x308   : > { %v1357_v57 = vperm.slane %v1351_v54, %v3706_v22  ;;  %v1373_v58 = vperm.slane %v1365_v56, %v3706_v22  ;;  %v1376_v59 = vrot.slane %v1361_v53, 4 }
 0x309   : > { %v1363_v60 = vsel %vm1078_vm0, %v1362_v55, %v1337_v39 }
 0x30a   : > { %v1369_v61 = vperm.slane %v1363_v60, %v3706_v22  ;;  %v1374_v50 = vrot.slane %v1357_v57, 4  ;;  %v1377_v62 = vsel %vm1078_vm0, 0.0, %v1376_v59  ;;  %v1380_v63 = vrot.slane %v1373_v58, 4 }
 0x30b   : > { %v1382_v0 = vsel %vm1078_vm0, %v1376_v59, %v1357_v57  ;;  %v1387_v1 = vrot.slane %v1377_v62, 4 }
 0x30c   : > { %v1375_v2 = vsel %vm1078_vm0, 0.0, %v1374_v50  ;;  %v1378_v3 = vrot.slane %v1369_v61, 4  ;;  %v1381_v4 = vsel %vm1078_vm0, 0.0, %v1380_v63  ;;  %v1386_v5 = vperm.slane %v1382_v0, %v3694_v7 }
 0x30d   : > { %v1388_v6 = vsel %vm1078_vm0, %v1387_v1, %v1375_v2  ;;  %v1393_v8 = vsel %vm1078_vm0, %v1380_v63, %v1369_v61  ;;  %v1398_v9 = vrot.slane %v1381_v4, 4 }
 0x30e   : > { %v1379_v10 = vsel %vm1078_vm0, 0.0, %v1378_v3  ;;  %v1392_v11 = vperm.slane %v1388_v6, %v3694_v7  ;;  %v1406_v12 = vrot.slane %v1386_v5, 4  ;;  %v1397_v13 = vperm.slane %v1393_v8, %v3694_v7 }
 0x30f   : > { %v1399_v15 = vsel %vm1078_vm0, %v1398_v9, %v1379_v10 }
 0x310   : > { %v1403_v16 = vperm.slane %v1399_v15, %v3694_v7  ;;  %v1407_v18 = vsel %vm1078_vm0, %v1392_v11, %v1406_v12  ;;  %v1418_v51 = vrot.slane %v1397_v13, 4  ;;  %v1404_v19 = vrot.slane %v1392_v11, 4 }
 0x311   : > { %v1415_v20 = vperm.slane %v1407_v18, %v3706_v22 }
 0x312   : > { %v1419_v21 = vsel %vm1078_vm0, %v1403_v16, %v1418_v51  ;;  %v1405_v23 = vsel %vm1078_vm0, %v1404_v19, %v1386_v5  ;;  %v1416_v24 = vrot.slane %v1403_v16, 4 }
 0x313   : > { %v1427_v25 = vperm.slane %v1419_v21, %v3706_v22  ;;  %v1434_v26 = vrot.slane %v1415_v20, 4  ;;  %v1411_v27 = vperm.slane %v1405_v23, %v3706_v22 }
 0x314   : > { %v1417_v28 = vsel %vm1078_vm0, %v1416_v24, %v1397_v13 }
 0x315   : > { %v1435_v30 = vsel %vm1078_vm0, %v1427_v25, %v1434_v26  ;;  %v1423_v31 = vperm.slane %v1417_v28, %v3706_v22  ;;  %v1430_v32 = vrot.slane %v1411_v27, 4  ;;  %v1432_v33 = vrot.slane %v1427_v25, 4 }
 0x316   : > { %v1439_v34 = vpack.c.bf16 %v1435_v30, %v1435_v30 }
 0x317   : > { %v1431_v35 = vsel %vm1078_vm0, %v1423_v31, %v1430_v32  ;;  %v1433_v38 = vsel %vm1078_vm0, %v1432_v33, %v1415_v20  ;;  %v1428_v39 = vrot.slane %v1423_v31, 4 }
 0x318   : > { %v1631_v41 = vsel %vm1572_vm3, %v1439_v34, 0  ;;  %v1437_v42 = vpack.c.bf16 %v1431_v35, %v1431_v35  ;;  %v1438_v36 = vpack.c.bf16 %v1433_v38, %v1433_v38 }
 0x319   : > { %1640 = vmatpush.bf16.msrb.mxu0 %v1631_v41  ;;  %v1429_v43 = vsel %vm1078_vm0, %v1428_v39, %v1411_v27 }
 0x31a   : > { %v1593_v44 = vsel %vm1572_vm3, %v1437_v42, 0  ;;  %v1612_v45 = vsel %vm1572_vm3, %v1438_v36, 0  ;;  %v1436_v47 = vpack.c.bf16 %v1429_v43, %v1429_v43 }
 0x31b   : > { %1602 = vmatpush.bf16.msrb.mxu2 %v1593_v44  ;;  %1621 = vmatpush.bf16.msra.mxu3 %v1612_v45 }
 0x31c   : > { %v1574_v49 = vsel %vm1572_vm3, %v1436_v47, 0 }
 0x31d   : > { %1583 = vmatpush.bf16.msrb.mxu1 %v1574_v49 }
 0x356   : > { %v1547_v46 = vpop.xlane.xlu2 %1546 }
 0x357   : > { %2836 = vrcp.f32 %v1547_v46 }
 0x35d   : > { %v2837_v52 = vpop.eup %2836 }
 0x35e   : > { %v1561_v40 = vmul.f32 %v2837_v52, %v3821_v17  ;;  %v1550_v53 = vpop.xlane.xlu1 %1549 }
 0x35f   : > { %2838 = vrcp.f32 %v1550_v53 }
 0x360   : > { %v1565_v54 = vpack.c.bf16 %v1561_v40, %v1561_v40 }
 0x362   : > { %2512 = vmatmul.msk.bf16.vlgmr.msrb.gmra.mxu1 %vm1520_vm2, %v1565_v54 }
 0x365   : > { %v2839_v55 = vpop.eup %2838 }
 0x366   : > { %v1562_v56 = vmul.f32 %v2839_v55, %v3825_v14 }
 0x368   : > { %v1566_v57 = vpack.c.bf16 %v1562_v56, %v1562_v56 }
 0x36a   : > { %2513 = vmatmul.msk.bf16.vlgmr.msrb.gmra.mxu2 %vm1520_vm2, %v1566_v57 }
 0x36e   : > { %v1553_v58 = vpop.xlane.xlu0 %1552 }
 0x36f   : > { %2840 = vrcp.f32 %v1553_v58 }
 0x375   : > { %v2841_v59 = vpop.eup %2840 }
 0x376   : > { %v1563_v60 = vmul.f32 %v2841_v59, %v3829_v29  ;;  %v1556_v61 = vpop.xlane.xlu0 %1555 }
 0x377   : > { %2842 = vrcp.f32 %v1556_v61 }
 0x378   : > { %v1567_v50 = vpack.c.bf16 %v1563_v60, %v1563_v60 }
 0x37a   : > { %2514 = vmatmul.msk.bf16.vlgmr.msra.gmra.mxu3 %vm1520_vm2, %v1567_v50 }
 0x37d   : > { %v2843_v17 = vpop.eup %2842 }
 0x37e   : > { %v1564_v62 = vmul.f32 %v2843_v17, %v3835_v37 }
 0x380   : > { %v1568_v63 = vpack.c.bf16 %v1564_v62, %v1564_v62 }
 0x382   : > { %2515 = vmatmul.msk.bf16.vlgmr.msrb.gmra.mxu0 %vm1520_vm2, %v1568_v63 }
 0x3df   : > { %v1585_v14 = vpop.f32.mrf.mxu1 }
 0x3e0   : > { %v1648_v3 = vrot.slane %v1585_v14, 4 }
 0x3e7   : > { %v1587_v0 = vpop.f32.mrf.mxu1 }
 0x3ed   : > { %v1604_v1 = vpop.f32.mrf.mxu2 }
 0x3ee   : > { %v1660_v5 = vrot.slane %v1604_v1, 4 }
 0x3f5   : > { %v1606_v2 = vpop.f32.mrf.mxu2 }
 0x3fd   : > { %v1623_v4 = vpop.f32.mrf.mxu3 }
 0x3fe   : > { %v1646_v6 = vrot.slane %v1623_v4, 4  ;;  %v1649_v29 = vsel %vm1078_vm0, %v1623_v4, %v1648_v3 }
 0x3ff   : > { %v1657_v8 = vperm.slane %v1649_v29, %v3694_v7  ;;  %v1642_v9 = vpop.f32.mrf.mxu0  ;;  %v2651_v29 = vld [vmem:[%s3593_s18 + $0x38] sm:$0xff] }
 0x400   : > { %v1647_v10 = vsel %vm1078_vm0, %v1646_v6, %v1585_v14  ;;  %v1658_v11 = vrot.slane %v1642_v9, 4  ;;  %v1661_v37 = vsel %vm1078_vm0, %v1642_v9, %v1660_v5  ;;  %1842 = vmatpush.bf16.msra.mxu1 %v2651_v29  ;;  %v2648_v9 = vld [vmem:[%s3593_s18 + $0x20] sm:$0xff] }
 0x401   : > { %v1653_v12 = vperm.slane %v1647_v10, %v3694_v7  ;;  %v1684_v13 = vrot.slane %v1657_v8, 4  ;;  %v1669_v15 = vperm.slane %v1661_v37, %v3694_v7  ;;  %v2647_v10 = vld [vmem:[%s3593_s18 + $0x18] sm:$0xff]  ;;  %v2645_v37 = vld [vmem:[%s3593_s18 + $0x8] sm:$0xff] }
 0x402   : > { %v1659_v16 = vsel %vm1078_vm0, %v1658_v11, %v1604_v1  ;;  %v2646_v11 = vld [vmem:[%s3593_s18 + $0x10] sm:$0xff] }
 0x403   : > { %v1672_v18 = vrot.slane %v1653_v12, 4  ;;  %v1665_v51 = vperm.slane %v1659_v16, %v3694_v7  ;;  %v1682_v19 = vrot.slane %v1669_v15, 4  ;;  %v1685_v20 = vsel %vm1078_vm0, %v1669_v15, %v1684_v13 }
 0x404   : > { %v1693_v21 = vperm.slane %v1685_v20, %v3706_v22 }
 0x405   : > { %v1670_v23 = vrot.slane %v1665_v51, 4  ;;  %v1673_v24 = vsel %vm1078_vm0, %v1665_v51, %v1672_v18  ;;  %v1683_v25 = vsel %vm1078_vm0, %v1682_v19, %v1657_v8  ;;  %v1625_v26 = vpop.f32.mrf.mxu3  ;;  %v2649_v8 = vld [vmem:[%s3593_s18 + $0x28] sm:$0xff] }
 0x406   : > { %v1681_v27 = vperm.slane %v1673_v24, %v3706_v22  ;;  %v1689_v28 = vperm.slane %v1683_v25, %v3706_v22  ;;  %v1700_v30 = vrot.slane %v1693_v21, 4  ;;  %v2821_v21 = vld [vmem:[%s4159_s6] ss:$0 sm:$0xff] }
 0x407   : > { %v1671_v31 = vsel %vm1078_vm0, %v1670_v23, %v1653_v12  ;;  %v1644_v32 = vpop.f32.mrf.mxu0  ;;  %v2644_v12 = vld [vmem:[%s3593_s18] sm:$0xff] }
 0x408   : > { %v1677_v33 = vperm.slane %v1671_v31, %v3706_v22  ;;  %v1696_v34 = vrot.slane %v1681_v27, 4  ;;  %v1698_v35 = vrot.slane %v1689_v28, 4  ;;  %v1701_v38 = vsel %vm1078_vm0, 0.0, %v1700_v30  ;;  %v2657_v31 = vld [vmem:[%s3595_s26 + $0x28] sm:$0xff]  ;;  %v2656_v32 = vld [vmem:[%s3595_s26 + $0x20] sm:$0xff] }
 0x409   : > { %v1713_v39 = vsel %vm1078_vm0, %v1700_v30, %v1689_v28  ;;  %v1718_v41 = vrot.slane %v1701_v38, 4  ;;  %v2659_v28 = vld [vmem:[%s3595_s26 + $0x38] sm:$0xff]  ;;  %v2658_v30 = vld [vmem:[%s3595_s26 + $0x30] sm:$0xff] }
 0x40a   : > { %v1694_v42 = vrot.slane %v1677_v33, 4  ;;  %v1697_v36 = vsel %vm1078_vm0, 0.0, %v1696_v34  ;;  %v1699_v43 = vsel %vm1078_vm0, 0.0, %v1698_v35  ;;  %v1717_v44 = vperm.slane %v1713_v39, %v3694_v7  ;;  %1958 = vmatpush.bf16.msra.mxu2 %v2659_v28  ;;  %v2654_v35 = vld [vmem:[%s3595_s26 + $0x10] sm:$0xff] }
 0x40b   : > { %v1707_v45 = vrot.slane %v1697_v36, 4  ;;  %v1702_v47 = vsel %vm1078_vm0, %v1696_v34, %v1677_v33  ;;  %v1719_v49 = vsel %vm1078_vm0, %v1718_v41, %v1699_v43  ;;  %v2655_v33 = vld [vmem:[%s3595_s26 + $0x18] sm:$0xff]  ;;  %v2653_v36 = vld [vmem:[%s3595_s26 + $0x8] sm:$0xff] }
 0x40c   : > { %v1695_v46 = vsel %vm1078_vm0, 0.0, %v1694_v42  ;;  %v1706_v52 = vperm.slane %v1702_v47, %v3694_v7  ;;  %v1723_v40 = vperm.slane %v1719_v49, %v3694_v7  ;;  %v1738_v53 = vrot.slane %v1717_v44, 4  ;;  %v2667_v43 = vld [vmem:[%s3601_s19 + $0x38] sm:$0xff]  ;;  %v2652_v49 = vld [vmem:[%s3595_s26] sm:$0xff] }
 0x40d   : > { %v1708_v54 = vsel %vm1078_vm0, %v1707_v45, %v1695_v46  ;;  %2041 = vmatpush.bf16.msrb.mxu3 %v2667_v43  ;;  %v2666_v45 = vld [vmem:[%s3601_s19 + $0x30] sm:$0xff]  ;;  %v2665_v46 = vld [vmem:[%s3601_s19 + $0x28] sm:$0xff] }
 0x40e   : > { %v1712_v55 = vperm.slane %v1708_v54, %v3694_v7  ;;  %v1726_v56 = vrot.slane %v1706_v52, 4  ;;  %v1739_v57 = vsel %vm1078_vm0, %v1723_v40, %v1738_v53  ;;  %v1736_v58 = vrot.slane %v1723_v40, 4  ;;  %1959 = vmatpush.bf16.msra.mxu2 %v2658_v30  ;;  %v2663_v54 = vld [vmem:[%s3601_s19 + $0x18] sm:$0xff] }
 0x40f   : > { %v1747_v59 = vperm.slane %v1739_v57, %v3706_v22  ;;  %v2662_v57 = vld [vmem:[%s3601_s19 + $0x10] sm:$0xff] }
 0x410   : > { %v1727_v60 = vsel %vm1078_vm0, %v1712_v55, %v1726_v56  ;;  %v1724_v61 = vrot.slane %v1712_v55, 4  ;;  %v1737_v50 = vsel %vm1078_vm0, %v1736_v58, %v1717_v44 }
 0x411   : > { %v1735_v17 = vperm.slane %v1727_v60, %v3706_v22  ;;  %v1752_v62 = vrot.slane %v1747_v59, 4  ;;  %v1743_v63 = vperm.slane %v1737_v50, %v3706_v22  ;;  %2042 = vmatpush.bf16.msrb.mxu3 %v2666_v45 }
 0x412   : > { %v1725_v7 = vsel %vm1078_vm0, %v1724_v61, %v1706_v52  ;;  %1960 = vmatpush.bf16.msra.mxu2 %v2657_v31  ;;  %v2664_v52 = vld [vmem:[%s3601_s19 + $0x20] sm:$0xff] }
 0x413   : > { %v1753_v14 = vsel %vm1078_vm0, %v1752_v62, %v1735_v17  ;;  %v1754_v0 = vrot.slane %v1735_v17, 4  ;;  %v1731_v1 = vperm.slane %v1725_v7, %v3706_v22  ;;  %v1748_v2 = vrot.slane %v1743_v63, 4  ;;  %v2650_v22 = vld [vmem:[%s3593_s18 + $0x30] sm:$0xff]  ;;  %v2822_v61 = vld [vmem:[%s836_s16] ss:$0 sm:$0xff] }
 0x414   : > { %1761 = vrot.lane.b32.xlu0 %v1753_v14, %s3237_s2  ;;  %1843 = vmatpush.bf16.msra.mxu1 %v2650_v22  ;;  %v2823_v62 = vld [vmem:[%s839_s11] ss:$0 sm:$0xff] }
 0x415   : > { %v1755_v3 = vsel %vm1078_vm0, %v1747_v59, %v1754_v0  ;;  %v1750_v4 = vrot.slane %v1731_v1, 4  ;;  %v1749_v5 = vsel %vm1078_vm0, %v1748_v2, %v1731_v1  ;;  %2043 = vmatpush.bf16.msrb.mxu3 %v2665_v46  ;;  %v2661_v0 = vld [vmem:[%s3601_s19 + $0x8] sm:$0xff]  ;;  %v2660_v1 = vld [vmem:[%s3601_s19] sm:$0xff] }
 0x416   : > { %1765 = vrot.lane.b32.xlu2 %v1755_v3, %s3236_s0  ;;  %1961 = vmatpush.bf16.msra.mxu2 %v2656_v32  ;;  %v2824_v2 = vld [vmem:[%s842_s4] ss:$0 sm:$0xff]  ;;  %s4164_s4 = sld [smem:[#allocation44_spill]] }
 0x417   : > { %v1751_v6 = vsel %vm1078_vm0, %v1743_v63, %v1750_v4  ;;  %v2825_v22 = vld [vmem:[%s845_s12] ss:$0 sm:$0xff] }
 0x418   : > { %1757 = vrot.lane.b32.xlu1 %v1751_v6, %s3238_s10  ;;  %1844 = vmatpush.bf16.msra.mxu1 %v2649_v8  ;;  %v2827_v32 = vld [vmem:[%s848_s23] ss:$0 sm:$0xff] }
 0x419   : > { %2044 = vmatpush.bf16.msrb.mxu3 %v2664_v52 }
 0x41a   : > { %1962 = vmatpush.bf16.msra.mxu2 %v2655_v33 }
 0x41c   : > { %1845 = vmatpush.bf16.msra.mxu1 %v2648_v9  ;;  %s4165_s12 = scalar_lea.vmem [#allocation15], %s4164_s4 }
 0x41d   : > { %2045 = vmatpush.bf16.msrb.mxu3 %v2663_v54  ;;  %v2826_v30 = vld [vmem:[%s4165_s12] ss:$0 sm:$0xff] }
 0x41e   : > { %1963 = vmatpush.bf16.msra.mxu2 %v2654_v35 }
 0x420   : > { %1846 = vmatpush.bf16.msra.mxu1 %v2647_v10 }
 0x421   : > { %2046 = vmatpush.bf16.msrb.mxu3 %v2662_v57 }
 0x422   : > { %1964 = vmatpush.bf16.msra.mxu2 %v2653_v36 }
 0x424   : > { %1847 = vmatpush.bf16.msra.mxu1 %v2646_v11 }
 0x425   : > { %2047 = vmatpush.bf16.msrb.mxu3 %v2661_v0 }
 0x426   : > { %1965 = vmatpush.bf16.msra.mxu2 %v2652_v49 }
 0x428   : > { %1848 = vmatpush.bf16.msra.mxu1 %v2645_v37 }
 0x429   : > { %2048 = vmatpush.bf16.msrb.mxu3 %v2660_v1 }
 0x42c   : > { %1849 = vmatpush.bf16.msra.mxu1 %v2644_v12 }
 0x470   : > { %v1766_v18 = vpop.permute.xlu2 %1765 }
 0x486   : > { %v1762_v15 = vpop.permute.xlu0 %1761 }
 0x48a   : > { %v1758_v13 = vpop.permute.xlu1 %1757 }
 0x48b   : > { %v1768_v16 = vsel %vm1443_vm1, %v1749_v5, %v1758_v13 }
 0x48c   : > { %v1770_v51 = vsel %vm1769_vm4, %v1768_v16, %v1762_v15 }
 0x48d   : > { %v1772_v19 = vsel %vm1771_vm5, %v1770_v51, %v1766_v18 }
 0x48e   : > { %v1773_v20 = vpack.c.bf16 %v1772_v19, %v1772_v19 }
 0x490   : > { %1850 = vmatmul.bf16.vlgmr.msra.gmra.mxu1 %v1773_v20 }
 0x50d   : > { %v1851_v23 = vpop.f32.mrf.mxu1 }
 0x50e   : > { %v1852_v24 = vadd.f32 %v2821_v21, %v1851_v23 }
 0x510   : > { %v1855_v25 = vadd.f32 %v1852_v24, %v3675_v48 }
 0x512   : > { %1858 = vadd.xlane.f32.xlu0 %v1855_v25  ;;  %v1860_v26 = vmul.f32 %v1855_v25, %v1855_v25 }
 0x514   : > { %1861 = vadd.xlane.f32.xlu1 %v1860_v26 }
 0x515   : > { %v1853_v27 = vpop.f32.mrf.mxu1 }
 0x585   : > { %v1859_v34 = vpop.xlane.xlu0 %1858 }
 0x586   : > { %v1863_v48 = vmul.f32 0.03125, %v1859_v34 }
 0x587   : > { %v1862_v38 = vpop.xlane.xlu1 %1861 }
 0x588   : > { %v1865_v39 = vmul.f32 %v1863_v48, %v1863_v48  ;;  %v1864_v41 = vmul.f32 0.03125, %v1862_v38  ;;  %v1868_v60 = vsub.f32 %v1855_v25, %v1863_v48 }
 0x58a   : > { %v1866_v42 = vsub.f32 %v1864_v41, %v1865_v39 }
 0x58c   : > { %v1867_v44 = vmax.f32 %v1866_v42, 0.0 }
 0x58e   : > { %v1869_v47 = vadd.f32 1e-05, %v1867_v44 }
 0x590   : > { %2844 = vrsqrt.f32 %v1869_v47  ;;  %vm1876_vm7 = vweird.f32 %v1869_v47 }
 0x596   : > { %v2845_v40 = vpop.eup %2844 }
 0x597   : > { %v1871_v53 = vmul.f32 %v2845_v40, %v1869_v47  ;;  %vm1877_vm6 = vweird.f32 %v2845_v40 }
 0x598   : > { %vm1878_vm8 = vmor %vm1876_vm7, %vm1877_vm6 }
 0x599   : > { %v1872_v55 = vmul.f32 %v2845_v40, %v1871_v53 }
 0x59b   : > { %v1873_v56 = vmul.f32 0.5, %v1872_v55 }
 0x59d   : > { %v1874_v58 = vsub.f32 1.5, %v1873_v56 }
 0x59f   : > { %v1875_v59 = vmul.f32 %v2845_v40, %v1874_v58 }
 0x5a1   : > { %v1879_v50 = vsel %vm1878_vm8, %v2845_v40, %v1875_v59 }
 0x5a2   : > { %v1880_v17 = vmul.f32 %v1879_v50, %v1868_v60 }
 0x5a4   : > { %v1884_v63 = vmul.f32 %v2822_v61, %v1880_v17 }
 0x5a6   : > { %v1888_v7 = vadd.f32 %v2823_v62, %v1884_v63 }
 0x5a8   : > { %v1889_v14 = vpack.c.bf16 %v1888_v7, %v1888_v7 }
 0x5aa   : > { %1966 = vmatmul.bf16.vlgmr.msra.gmra.mxu2 %v1889_v14 }
 0x62d   : > { %v1967_v3 = vpop.f32.mrf.mxu2 }
 0x62e   : > { %v1968_v4 = vadd.f32 %v2824_v2, %v1967_v3 }
 0x630   : > { %v1971_v5 = vmax.f32 %v1968_v4, 0.0 }
 0x632   : > { %v1972_v6 = vpack.c.bf16 %v1971_v5, %v1971_v5 }
 0x634   : > { %2049 = vmatmul.bf16.vlgmr.msrb.gmra.mxu3 %v1972_v6 }
 0x635   : > { %v1969_v29 = vpop.f32.mrf.mxu2 }
 0x6b7   : > { %v2050_v8 = vpop.f32.mrf.mxu3 }
 0x6b8   : > { %v2051_v9 = vadd.f32 %v2825_v22, %v2050_v8 }
 0x6ba   : > { %v2054_v10 = vadd.f32 %v2051_v9, %v1888_v7 }
 0x6bc   : > { %2057 = vadd.xlane.f32.xlu2 %v2054_v10  ;;  %v2059_v11 = vmul.f32 %v2054_v10, %v2054_v10 }
 0x6be   : > { %2060 = vadd.xlane.f32.xlu0 %v2059_v11 }
 0x6bf   : > { %v2052_v37 = vpop.f32.mrf.mxu3 }
 0x72f   : > { %v2058_v12 = vpop.xlane.xlu2 %2057 }
 0x730   : > { %v2062_v13 = vmul.f32 0.03125, %v2058_v12 }
 0x731   : > { %v2061_v15 = vpop.xlane.xlu0 %2060 }
 0x732   : > { %v2064_v16 = vmul.f32 %v2062_v13, %v2062_v13  ;;  %v2063_v18 = vmul.f32 0.03125, %v2061_v15  ;;  %v2067_v28 = vsub.f32 %v2054_v10, %v2062_v13 }
 0x734   : > { %v2065_v51 = vsub.f32 %v2063_v18, %v2064_v16 }
 0x736   : > { %v2066_v19 = vmax.f32 %v2065_v51, 0.0 }
 0x738   : > { %v2068_v20 = vadd.f32 1e-05, %v2066_v19 }
 0x73a   : > { %2846 = vrsqrt.f32 %v2068_v20  ;;  %vm2075_vm10 = vweird.f32 %v2068_v20 }
 0x740   : > { %v2847_v21 = vpop.eup %2846 }
 0x741   : > { %v2070_v23 = vmul.f32 %v2847_v21, %v2068_v20  ;;  %vm2076_vm9 = vweird.f32 %v2847_v21 }
 0x742   : > { %vm2077_vm11 = vmor %vm2075_vm10, %vm2076_vm9 }
 0x743   : > { %v2071_v24 = vmul.f32 %v2847_v21, %v2070_v23 }
 0x745   : > { %v2072_v25 = vmul.f32 0.5, %v2071_v24 }
 0x747   : > { %v2073_v26 = vsub.f32 1.5, %v2072_v25 }
 0x749   : > { %v2074_v27 = vmul.f32 %v2847_v21, %v2073_v26 }
 0x74b   : > { %v2078_v31 = vsel %vm2077_vm11, %v2847_v21, %v2074_v27 }
 0x74c   : > { %v2079_v33 = vmul.f32 %v2078_v31, %v2067_v28 }
 0x74e   : > { %v2083_v34 = vmul.f32 %v2826_v30, %v2079_v33  ;;  %2092 = sbr.rel (%p2612_p1) target bundleno = 1876 (0x754), region = 116 }
 0x750   : > { %v2087_v48 = vadd.f32 %v2827_v32, %v2083_v34 }
 0x752   : > { %2088 = vst [vmem:[#allocation2] sm:$0xff] %v2087_v48 }
 0x753   : > { %2093 = vst [vmem:[%s3639_s24] sm:$0xff] %v2087_v48 }
 0x754 PF: > { %s4168_s14 = sld [smem:[#allocation31_spill]]  ;;  %s2107_s23 = sshll.u32 %s3639_s24, 4  ;;  %s2108_s23 = int_to_ptr.vmem [resolvable:$true] %s2107_s23 }
 0x755   : > { %s4170_s21 = sld [smem:[#allocation59_spill]]  ;;  %s2095_s6 = scalar_lea.sflag [#allocation5], %s3557_s3 }
 0x75a   : > { %s2614_s2 = sshll.u32 %s4168_s14, 3 }
 0x75b   : > { %s4171_s25 = smov %s4170_s21  ;;  %s2105_s5 = scalar_lea.hbm %s4170_s21, %s2614_s2 }
 0x75c   : > { %s2109_s22 = sshll.u32 %s2105_s5, 4  ;;  %s3108_s28 = scalar_lea.hbm %s4171_s25, 16  ;;  %s2110_s22 = int_to_ptr.hbm [resolvable:$true] %s2109_s22 }
 0x75d   : > { %s3102_s17 = sshra.s32 %s2110_s22, 4  ;;  %s3103_s17 = int_to_ptr.hbm [resolvable:$true] %s3102_s17 }
 0x75e   : > { %s3104_s8 = scalar_lea.hbm %s3103_s17, 8  ;;  %p3109_p4 = scmp.lt.s32.totalorder %s3103_s17, %s4171_s25 }
 0x75f   : > { %p3105_p0 = scmp.ne.s32.totalorder %s3103_s17, %s3104_s8  ;;  %p3110_p6 = scmp.lt.s32.totalorder %s3108_s28, %s3104_s8 }
 0x761   : > { %p3106_p2 = pnand %p3105_p0, %p3408_p12  ;;  %p3111_p7 = por %p3110_p6, %p3109_p4 }
 0x763   : > { %p3107_p3 = pneg %p3106_p2 }
 0x765   : > { %p3112_p8 = pnand %p3111_p7, %p3107_p3 }
 0x767   : > { %3115 = shalt.err (!%p3112_p8)
}
 0x768   : > { %2690 = dma.vmem_to_hbm [thread:$0]  (%p3408_p12), %s2108_s23, 128, %s2110_s22, %s2095_s6  }
 0x769 PF: > { %s4172_s3 = sld [smem:[#allocation34_spill]] }
 0x76a   : > { %s4173_s24 = sld [smem:[#allocation27_spill]] }
 0x76f   : > { %p2722_p9 = scmp.ge.s32.totalorder %s4172_s3, 2 }
 0x770   : > { %s2121_s13 = sand.u32 1, %s4173_s24  }
 0x771   : > { %p2718_p10 = pnand %p2722_p9, %p3412_p13  ;;  %s2122_s11 = scalar_lea.sflag [#allocation5], %s2121_s13 }
 0x773   : > { %p2719_p5 = pneg %p2718_p10 }
 0x775   : > { %3185 = dma.done.wait (%p2719_p5), %s2122_s11, 128  }
 0x776   : > { %3187 = vsyncadd (%p2719_p5), %s2122_s11, 4294967168  ;;  %s42_s23 = sadd.s32 1, %s4172_s3   ;;  %s4175_s29 = sld [smem:[#allocation25_spill]] }
 0x777   : > { %p39_p11 = scmp.ge.s32.totalorder %s42_s23, 6   ;;  %s4176_s30 = sld [smem:[#allocation26_spill]] }
 0x778   : > { %s4177_s15 = sld [smem:[#allocation42_spill]] }
 0x779   : > { %s4178_s16 = sld [smem:[#allocation28_spill]] }
 0x77a   : > { %s4179_s17 = sld [smem:[#allocation29_spill]] }
 0x77b   : > { %s4180_s18 = sld [smem:[#allocation43_spill]]  ;;  %41 = sbr.rel (!%p39_p11) target bundleno = 33 (0x21), region = 232 }
 0x77c   : > { %s4181_s19 = sld [smem:[#allocation32_spill]] }
 0x77d   : > { %s4182_s20 = sld [smem:[#allocation33_spill]] }
 0x77e   : > { %s4183_s21 = sld [smem:[#allocation40_spill]] }
 0x77f   : > { %s4184_s22 = sld [smem:[#allocation41_spill]] }
 0x780   :  { %2128 = vsyncpa [#allocation4], 1 }
 0x781   :  { %2130 = vsyncpa [#allocation4 + $0x1], 1 }
 0x782   :  { %2131 = vsyncpa [#allocation7], 1 }
 0x783   :  { %2133 = vsyncpa [#allocation7 + $0x1], 1 }
 0x784   :  { %2134 = vsyncpa [#allocation10], 1 }
 0x785   :  { %2136 = vsyncpa [#allocation10 + $0x1], 1 }
 0x786   :  { %2137 = vsyncpa [#allocation13], 1 }
 0x787   :  { %2139 = vsyncpa [#allocation13 + $0x1], 1 }
 0x788   :  { %2140 = vsyncpa [#allocation16], 1 }
 0x789   :  { %2142 = vsyncpa [#allocation16 + $0x1], 1 }
 0x78a   :  { %2143 = vsyncpa [#allocation5], 1 }
 0x78b   :  { %2145 = vsyncpa [#allocation5 + $0x1], 1 }

</bundles_post_ra>
